<compile_context>
chip_gen: v5e
topology: v5e:2x2
jax: 0.10.0
libtpu: 0.0.40
codegen_flags: <defaults>
</compile_context>

<pallas_src>
import functools
import math

import jax
import jax.numpy as jnp
from jax.experimental import pallas as pl
from jax.experimental.pallas import tpu as pltpu


def _round_up(a, b):
    return ((a + b - 1) // b) * b


def _round_half_even_to_int(x):
    """Round-half-to-even, matching torch grid_sample 'nearest' (nearbyint)."""
    f = jnp.floor(x + 0.5)
    fi = f.astype(jnp.int32)
    tie = (x + 0.5) == f
    odd = (fi & 1) == 1
    return jnp.where(tie & odd, fi - 1, fi)


def _warp_kernel(x_ref, g_ref, o_ref, m_ref, *, D, H, W, Dc, mode, separable,
                 single_k):
    """One (batch n, output-voxel tile p, moving D-chunk k) grid step.

    x_ref : (1, C, Sc)  moving-volume chunk (compute dtype), Sc = Dc*H*W
    g_ref : (1, 3, TP)  f32 normalized coords in [-1, 1], channels = (x, y, z)
    o_ref : (1, C, TP)  f32 warped output tile (accumulated over k)
    m_ref : (Sc, TP)    VMEM scratch: interpolation ("one-hot gather") slab
    """
    Sc, TP = m_ref.shape
    k = pl.program_id(2)
    z_off = k * Dc                       # first global z index of this chunk

    g = g_ref[0]                         # (3, TP)
    gx = g[0:1, :]                       # -> W axis
    gy = g[1:2, :]                       # -> H axis
    gz = g[2:3, :]                       # -> D axis

    # align_corners=True unnormalization; padding_mode='border' => clamp.
    px = jnp.clip((gx + 1.0) * (0.5 * (W - 1)), 0.0, float(W - 1))
    py = jnp.clip((gy + 1.0) * (0.5 * (H - 1)), 0.0, float(H - 1))
    pz = jnp.clip((gz + 1.0) * (0.5 * (D - 1)), 0.0, float(D - 1))

    if mode == "nearest":
        z_list = [(_round_half_even_to_int(pz), None)]   # weight None == 1.0
        y_list = [(_round_half_even_to_int(py), None)]
        x_list = [(_round_half_even_to_int(px), None)]
    else:  # torch 'bilinear' == trilinear for 5-D inputs
        z0 = jnp.floor(pz); wz1 = pz - z0; iz0 = z0.astype(jnp.int32)
        y0 = jnp.floor(py); wy1 = py - y0; iy0 = y0.astype(jnp.int32)
        x0 = jnp.floor(px); wx1 = px - x0; ix0 = x0.astype(jnp.int32)
        z_list = [(iz0, 1.0 - wz1), (jnp.minimum(iz0 + 1, D - 1), wz1)]
        y_list = [(iy0, 1.0 - wy1), (jnp.minimum(iy0 + 1, H - 1), wy1)]
        x_list = [(ix0, 1.0 - wx1), (jnp.minimum(ix0 + 1, W - 1), wx1)]

    def wmul(a, b):
        if a is None:
            return b
        if b is None:
            return a
        return a * b

    def mask_sum(iota, pairs):
        # One fused expression: no zero-init, no per-corner read-modify-write.
        acc = None
        for idx, w in pairs:
            term = jnp.where(iota == idx, 1.0 if w is None else w, 0.0)
            acc = term if acc is None else acc + term
        return acc

    if separable:
        # Separable build: combined (z, y) factor + tiny x factor, then one
        # broadcast multiply and one store pass into the slab scratch.
        # Out-of-chunk corners (iz outside [z_off, z_off+Dc)) produce a flat
        # row index outside [0, Dc*H) and never match -> weight 0.
        r_iota = jax.lax.broadcasted_iota(jnp.int32, (Dc * H, 1), 0)
        zy_pairs = [((iz - z_off) * H + iy, wmul(wz, wy))
                    for iz, wz in z_list for iy, wy in y_list]
        zy = mask_sum(r_iota, zy_pairs)                          # (Dc*H, TP)
        w_iota = jax.lax.broadcasted_iota(jnp.int32, (W, 1), 0)
        mx = mask_sum(w_iota, x_list)                            # (W, TP)
        slab = zy[:, None, :] * mx[None, :, :]                   # (Dc*H, W, TP)
        m_ref[...] = slab.reshape(Sc, TP).astype(m_ref.dtype)
    else:
        # Fallback when W % 8 != 0 (the separable reshape would relayout):
        # fused flat-index corner sum, still a single slab store pass.
        s_iota = jax.lax.broadcasted_iota(jnp.int32, (Sc, 1), 0)
        s_pairs = [(((iz - z_off) * H + iy) * W + ix,
                    wmul(wmul(wz, wy), wx))
                   for iz, wz in z_list
                   for iy, wy in y_list
                   for ix, wx in x_list]
        m_ref[...] = mask_sum(s_iota, s_pairs).astype(m_ref.dtype)

    # MXU "gather": out (C, TP) += x (C, Sc) @ M (Sc, TP), f32 accumulation.
    contrib = jnp.dot(x_ref[0], m_ref[...], preferred_element_type=jnp.float32)
    if single_k:
        o_ref[0] = contrib
    else:
        @pl.when(k == 0)
        def _():
            o_ref[...] = jnp.zeros_like(o_ref)
        o_ref[0] = o_ref[0] + contrib


def _vmem_budget():
    """(tiling budget, vmem_limit_bytes), tuned per TPU generation."""
    mib = 1024 * 1024
    cap = None
    try:
        cap = int(pltpu.get_tpu_info().vmem_capacity_bytes)
    except Exception:
        cap = None
    if cap is not None and cap >= 100 * mib:     # v4/v5e/v6e: 128 MiB VMEM
        return 96 * mib, 112 * mib
    return 40 * mib, 48 * mib                     # v7x (64 MiB / core) or unknown


def _choose_tiling(D, H, W, C, P, item_bytes, budget, tp=None):
    """Pick (tp, Dc): output-voxel lane tile and moving-volume D-chunk."""
    HW = H * W
    P128 = max(128, _round_up(P, 128))

    def fits(sc, tpv):
        slab = sc * tpv * (item_bytes + 4)        # M scratch + ~1 f32 build temp
        xblk = 2 * C * sc * item_bytes            # double-buffered x chunk
        small = 2 * (3 + C) * tpv * 4             # coords + out tiles (dbl-buf)
        return slab + xblk + small <= budget

    if tp is not None:
        cands = [max(128, (min(int(tp), P128) // 128) * 128)]
    else:
        # 256-aligned tiles preferred (v6e/v7x MXU width); 128 only as fallback.
        cands = [t for t in (2048, 1024, 512, 256, 128) if t <= P128] or [128]

    # smallest D-chunk keeping the flattened chunk 128-lane aligned
    dc_unit = max(1, 128 // math.gcd(HW, 128))

    for tpv in cands:
        if fits(D * HW, tpv):
            return tpv, D                         # whole moving volume resident
        dc = max(dc_unit,
                 (min(D, budget // max(1, tpv * (item_bytes + 4) * HW))
                  // dc_unit) * dc_unit)
        while dc > dc_unit and not fits(dc * HW, tpv):
            dc -= dc_unit
        if fits(dc * HW, tpv):
            return tpv, dc
    return cands[-1], dc_unit


def _warp_pallas(x, coords, mode, *, tp=None, dc=None):
    """x: (N, C, D, H, W) in the compute dtype; coords: (N, 3, P) f32."""
    N, C, D, H, W = x.shape
    P = coords.shape[2]
    HW = H * W

    item_bytes = jnp.dtype(x.dtype).itemsize
    budget, vmem_limit = _vmem_budget()
    tp_sel, dc_sel = _choose_tiling(D, H, W, C, P, item_bytes, budget, tp=tp)
    if dc is not None:
        dc_sel = int(dc)
    dc_sel = min(dc_sel, D)
    if dc_sel < D and (dc_sel * HW) % 128 != 0:
        raise ValueError("D-chunk must keep Dc*H*W a multiple of 128")

    D_pad = _round_up(D, dc_sel)
    K = D_pad // dc_sel
    Sc = dc_sel * HW

    if D_pad != D:
        # Padded z slabs are never addressed (corner indices clamp to D-1).
        x = jnp.pad(x, ((0, 0), (0, 0), (0, D_pad - D), (0, 0), (0, 0)))
    x_flat = x.reshape(N, C, D_pad * HW)

    P_pad = _round_up(P, tp_sel)
    if P_pad != P:
        # Padded columns sample voxel (0,0,0); they are sliced off below.
        coords = jnp.pad(coords, ((0, 0), (0, 0), (0, P_pad - P)),
                         constant_values=-1.0)

    kernel = functools.partial(
        _warp_kernel, D=D, H=H, W=W, Dc=dc_sel, mode=mode,
        separable=(W % 8 == 0), single_k=(K == 1))

    out = pl.pallas_call(
        kernel,
        out_shape=jax.ShapeDtypeStruct((N, C, P_pad), jnp.float32),
        grid_spec=pltpu.PrefetchScalarGridSpec(
            num_scalar_prefetch=0,
            grid=(N, P_pad // tp_sel, K),
            in_specs=[
                # x chunk: independent of the p axis -> resident across p
                # tiles when K == 1; streamed over k otherwise.
                pl.BlockSpec((1, C, Sc), lambda n, p, k: (n, 0, k)),
                pl.BlockSpec((1, 3, tp_sel), lambda n, p, k: (n, 0, p)),
            ],
            out_specs=pl.BlockSpec((1, C, tp_sel), lambda n, p, k: (n, 0, p)),
            scratch_shapes=[pltpu.VMEM((Sc, tp_sel), x.dtype)],
        ),
        compiler_params=pltpu.CompilerParams(
            # N outermost parallel axis -> batch sharding across v7x's 2 TCs;
            # k is the reduction axis (accumulates into the resident out tile).
            dimension_semantics=("parallel", "parallel", "arbitrary"),
            vmem_limit_bytes=int(vmem_limit),
        ),
    )(x_flat, coords)
    return out[:, :, :P]


def registration_forward(im_or_seg_moving, transformation, *, tp=None, dc=None,
                         precision=None):
    """JAX/Pallas equivalent of RegistrationModule.forward.

    im_or_seg_moving: (N, C, D, H, W)
        float32 -> image -> trilinear warp
        bool    -> mask  -> nearest warp, cast back to bool
        int16   -> seg   -> nearest warp, cast back to int16
    transformation: (N, 3, Do, Ho, Wo) float32, normalized coords in [-1, 1]
        (channel order x, y, z -- what torch sees after its permute).
    precision: None (default: f32; bf16 for bool masks where it is exact) or an
        explicit dtype ("bfloat16" trades ~1e-2 rel error for ~3x MXU rate;
        do not use for seg labels > 256).

    Note: inputs sharing a transformation AND interpolation mode can be
    stacked along C and warped in one call to amortize the slab build.
    """
    N, C, D, H, W = im_or_seg_moving.shape
    Nt, three, Do, Ho, Wo = transformation.shape
    assert three == 3 and Nt == N

    dt = im_or_seg_moving.dtype
    is_mask = dt == jnp.bool_
    is_seg = dt == jnp.int16
    is_im = dt == jnp.float32
    if not (is_mask or is_seg or is_im):
        raise NotImplementedError
    # TODO(synk): torch's .type() string dispatch (CPU vs CUDA tensor classes)
    # has no JAX analogue; dispatch is purely on dtype here.
    mode = "nearest" if (is_mask or is_seg) else "bilinear"

    if precision is not None:
        compute_dtype = jnp.dtype(precision)
    else:
        # bf16 is exact for 0/1 masks (one-hot slab x 0/1 values); keep f32
        # for images (torch parity) and int16 seg labels.
        compute_dtype = jnp.bfloat16 if is_mask else jnp.float32

    x = im_or_seg_moving.astype(compute_dtype)
    coords = transformation.astype(jnp.float32).reshape(N, 3, Do * Ho * Wo)

    out = _warp_pallas(x, coords, mode, tp=tp, dc=dc)
    out = out.reshape(N, C, Do, Ho, Wo)

    if is_mask:
        return out.astype(jnp.bool_)
    if is_seg:
        return out.astype(jnp.int16)
    return out


if __name__ == "__main__":
    key = jax.random.PRNGKey(0)
    k1, k2, k3 = jax.random.split(key, 3)

    N, C, D, H, W = 2, 4, 8, 8, 8

    im = jax.random.normal(k1, (N, C, D, H, W), dtype=jnp.float32)
    mask = im[:, :1] > 0.0                                           # bool
    seg = jax.random.randint(k3, (N, 1, D, H, W), 0, 5).astype(jnp.int16)

    # identity sampling grid (channels x, y, z) plus a small random displacement
    zs = jnp.linspace(-1.0, 1.0, D)
    ys = jnp.linspace(-1.0, 1.0, H)
    xs = jnp.linspace(-1.0, 1.0, W)
    zz, yy, xx = jnp.meshgrid(zs, ys, xs, indexing="ij")
    ident = jnp.stack([xx, yy, zz], axis=0).astype(jnp.float32)      # (3,D,H,W)
    disp = 0.1 * jax.random.normal(k2, (N, 3, D, H, W), dtype=jnp.float32)
    transformation = jnp.clip(ident[None] + disp, -1.0, 1.0)
    transformation_id = jnp.broadcast_to(ident[None], (N, 3, D, H, W))

    # image (trilinear), mask (nearest -> bool, bf16 path), seg (nearest -> i16)
    out_im = jax.block_until_ready(registration_forward(im, transformation))
    out_mask = jax.block_until_ready(registration_forward(mask, transformation))
    out_seg = jax.block_until_ready(registration_forward(seg, transformation))
    assert out_im.shape == (N, C, D, H, W)
    assert out_mask.dtype == jnp.bool_ and out_seg.dtype == jnp.int16

    # identity grid reproduces the inputs
    out_id = jax.block_until_ready(registration_forward(im, transformation_id))
    assert float(jnp.max(jnp.abs(out_id - im))) < 1e-3
    out_mask_id = jax.block_until_ready(
        registration_forward(mask, transformation_id))
    assert bool(jnp.all(out_mask_id == mask))
    out_seg_id = jax.block_until_ready(
        registration_forward(seg, transformation_id))
    assert bool(jnp.all(out_seg_id == seg))

    # forcing a small P tile (multiple inner p steps) matches
    out_im_t128 = jax.block_until_ready(
        registration_forward(im, transformation, tp=128))
    assert float(jnp.max(jnp.abs(out_im - out_im_t128))) < 1e-5

    # forcing D-chunking (k reduction axis, K=4) matches
    out_im_dc2 = jax.block_until_ready(
        registration_forward(im, transformation, dc=2))
    assert float(jnp.max(jnp.abs(out_im - out_im_dc2))) < 1e-5

    # non-128-multiple output voxel count (P padded + sliced) matches
    out_im_part = jax.block_until_ready(
        registration_forward(im, transformation[:, :, :7]))
    assert out_im_part.shape == (N, C, 7, H, W)
    assert float(jnp.max(jnp.abs(out_im_part - out_im[:, :, :7]))) < 1e-5

    # opt-in bf16 trilinear path stays close to the f32 reference
    out_im_bf16 = jax.block_until_ready(
        registration_forward(im, transformation, precision="bfloat16"))
    assert float(jnp.max(jnp.abs(out_im_bf16 - out_im))) < 0.25

    print("KERNEL_OK")
</pallas_src>

<mosaic_0001>
module attributes {stable_mosaic.version = 11 : i64} {
  func.func @_warp_kernel(%arg0: i32, %arg1: i32, %arg2: i32, %arg3: memref<1x4x512xf32, #tpu.memory_space<vmem>>, %arg4: memref<1x3x512xf32, #tpu.memory_space<vmem>>, %arg5: memref<1x4x512xf32, #tpu.memory_space<vmem>>, %arg6: memref<512x512xf32, #tpu.memory_space<vmem>>) attributes {dimension_semantics = [#tpu.dimension_semantics<parallel>, #tpu.dimension_semantics<parallel>, #tpu.dimension_semantics<arbitrary>], iteration_bounds = array<i64: 2, 1, 1>, scalar_prefetch = 0 : i64, scratch_operands = 1 : i64, tpu.core_type = #tpu.core_type<tc>, window_params = [{transform_indices = @transform_0, window_bounds = array<i64: 1, 4, 512>}, {transform_indices = @transform_1, window_bounds = array<i64: 1, 3, 512>}, {transform_indices = @transform_2, window_bounds = array<i64: 1, 4, 512>}]} {
    %c8_i32 = arith.constant 8 : i32
    %0 = arith.muli %arg2, %c8_i32 : i32
    %c0 = arith.constant 0 : index
    %c0_0 = arith.constant 0 : index
    %c0_1 = arith.constant 0 : index
    %1 = vector.load %arg4[%c0, %c0_0, %c0_1] : memref<1x3x512xf32, #tpu.memory_space<vmem>>, vector<1x3x512xf32>
    %2 = vector.shape_cast %1 : vector<1x3x512xf32> to vector<3x512xf32>
    %3 = vector.extract_strided_slice %2 {offsets = [0, 0], sizes = [1, 512], strides = [1, 1]} : vector<3x512xf32> to vector<1x512xf32>
    %4 = vector.extract_strided_slice %2 {offsets = [1, 0], sizes = [1, 512], strides = [1, 1]} : vector<3x512xf32> to vector<1x512xf32>
    %5 = vector.extract_strided_slice %2 {offsets = [2, 0], sizes = [1, 512], strides = [1, 1]} : vector<3x512xf32> to vector<1x512xf32>
    %cst = arith.constant 1.000000e+00 : f32
    %6 = vector.broadcast %cst : f32 to vector<1x512xf32>
    %7 = arith.addf %3, %6 : vector<1x512xf32>
    %cst_2 = arith.constant 3.500000e+00 : f32
    %8 = vector.broadcast %cst_2 : f32 to vector<1x512xf32>
    %9 = arith.mulf %7, %8 : vector<1x512xf32>
    %cst_3 = arith.constant 0.000000e+00 : f32
    %cst_4 = arith.constant 7.000000e+00 : f32
    %10 = vector.broadcast %cst_3 : f32 to vector<1x512xf32>
    %11 = arith.maximumf %10, %9 : vector<1x512xf32>
    %12 = vector.broadcast %cst_4 : f32 to vector<1x512xf32>
    %13 = arith.minimumf %12, %11 : vector<1x512xf32>
    %cst_5 = arith.constant 1.000000e+00 : f32
    %14 = vector.broadcast %cst_5 : f32 to vector<1x512xf32>
    %15 = arith.addf %4, %14 : vector<1x512xf32>
    %cst_6 = arith.constant 3.500000e+00 : f32
    %16 = vector.broadcast %cst_6 : f32 to vector<1x512xf32>
    %17 = arith.mulf %15, %16 : vector<1x512xf32>
    %cst_7 = arith.constant 0.000000e+00 : f32
    %cst_8 = arith.constant 7.000000e+00 : f32
    %18 = vector.broadcast %cst_7 : f32 to vector<1x512xf32>
    %19 = arith.maximumf %18, %17 : vector<1x512xf32>
    %20 = vector.broadcast %cst_8 : f32 to vector<1x512xf32>
    %21 = arith.minimumf %20, %19 : vector<1x512xf32>
    %cst_9 = arith.constant 1.000000e+00 : f32
    %22 = vector.broadcast %cst_9 : f32 to vector<1x512xf32>
    %23 = arith.addf %5, %22 : vector<1x512xf32>
    %cst_10 = arith.constant 3.500000e+00 : f32
    %24 = vector.broadcast %cst_10 : f32 to vector<1x512xf32>
    %25 = arith.mulf %23, %24 : vector<1x512xf32>
    %cst_11 = arith.constant 0.000000e+00 : f32
    %cst_12 = arith.constant 7.000000e+00 : f32
    %26 = vector.broadcast %cst_11 : f32 to vector<1x512xf32>
    %27 = arith.maximumf %26, %25 : vector<1x512xf32>
    %28 = vector.broadcast %cst_12 : f32 to vector<1x512xf32>
    %29 = arith.minimumf %28, %27 : vector<1x512xf32>
    %30 = math.floor %29 : vector<1x512xf32>
    %31 = arith.subf %29, %30 : vector<1x512xf32>
    %32 = arith.fptosi %30 : vector<1x512xf32> to vector<1x512xi32>
    %33 = math.floor %21 : vector<1x512xf32>
    %34 = arith.subf %21, %33 : vector<1x512xf32>
    %35 = arith.fptosi %33 : vector<1x512xf32> to vector<1x512xi32>
    %36 = math.floor %13 : vector<1x512xf32>
    %37 = arith.subf %13, %36 : vector<1x512xf32>
    %38 = arith.fptosi %36 : vector<1x512xf32> to vector<1x512xi32>
    %cst_13 = arith.constant 1.000000e+00 : f32
    %39 = vector.broadcast %cst_13 : f32 to vector<1x512xf32>
    %40 = arith.subf %39, %31 : vector<1x512xf32>
    %c1_i32 = arith.constant 1 : i32
    %41 = vector.broadcast %c1_i32 : i32 to vector<1x512xi32>
    %42 = arith.addi %32, %41 : vector<1x512xi32>
    %c7_i32 = arith.constant 7 : i32
    %43 = vector.broadcast %c7_i32 : i32 to vector<1x512xi32>
    %44 = arith.minsi %42, %43 : vector<1x512xi32>
    %cst_14 = arith.constant 1.000000e+00 : f32
    %45 = vector.broadcast %cst_14 : f32 to vector<1x512xf32>
    %46 = arith.subf %45, %34 : vector<1x512xf32>
    %c1_i32_15 = arith.constant 1 : i32
    %47 = vector.broadcast %c1_i32_15 : i32 to vector<1x512xi32>
    %48 = arith.addi %35, %47 : vector<1x512xi32>
    %c7_i32_16 = arith.constant 7 : i32
    %49 = vector.broadcast %c7_i32_16 : i32 to vector<1x512xi32>
    %50 = arith.minsi %48, %49 : vector<1x512xi32>
    %cst_17 = arith.constant 1.000000e+00 : f32
    %51 = vector.broadcast %cst_17 : f32 to vector<1x512xf32>
    %52 = arith.subf %51, %37 : vector<1x512xf32>
    %c1_i32_18 = arith.constant 1 : i32
    %53 = vector.broadcast %c1_i32_18 : i32 to vector<1x512xi32>
    %54 = arith.addi %38, %53 : vector<1x512xi32>
    %c7_i32_19 = arith.constant 7 : i32
    %55 = vector.broadcast %c7_i32_19 : i32 to vector<1x512xi32>
    %56 = arith.minsi %54, %55 : vector<1x512xi32>
    %57 = tpu.iota {dimensions = array<i32: 0>} : vector<64x1xi32>
    %58 = vector.broadcast %0 : i32 to vector<1x512xi32>
    %59 = arith.subi %32, %58 : vector<1x512xi32>
    %c8_i32_20 = arith.constant 8 : i32
    %60 = vector.broadcast %c8_i32_20 : i32 to vector<1x512xi32>
    %61 = arith.muli %59, %60 : vector<1x512xi32>
    %62 = arith.addi %61, %35 : vector<1x512xi32>
    %63 = arith.mulf %40, %46 : vector<1x512xf32>
    %64 = vector.broadcast %0 : i32 to vector<1x512xi32>
    %65 = arith.subi %32, %64 : vector<1x512xi32>
    %c8_i32_21 = arith.constant 8 : i32
    %66 = vector.broadcast %c8_i32_21 : i32 to vector<1x512xi32>
    %67 = arith.muli %65, %66 : vector<1x512xi32>
    %68 = arith.addi %67, %50 : vector<1x512xi32>
    %69 = arith.mulf %40, %34 : vector<1x512xf32>
    %70 = vector.broadcast %0 : i32 to vector<1x512xi32>
    %71 = arith.subi %44, %70 : vector<1x512xi32>
    %c8_i32_22 = arith.constant 8 : i32
    %72 = vector.broadcast %c8_i32_22 : i32 to vector<1x512xi32>
    %73 = arith.muli %71, %72 : vector<1x512xi32>
    %74 = arith.addi %73, %35 : vector<1x512xi32>
    %75 = arith.mulf %31, %46 : vector<1x512xf32>
    %76 = vector.broadcast %0 : i32 to vector<1x512xi32>
    %77 = arith.subi %44, %76 : vector<1x512xi32>
    %c8_i32_23 = arith.constant 8 : i32
    %78 = vector.broadcast %c8_i32_23 : i32 to vector<1x512xi32>
    %79 = arith.muli %77, %78 : vector<1x512xi32>
    %80 = arith.addi %79, %50 : vector<1x512xi32>
    %81 = arith.mulf %31, %34 : vector<1x512xf32>
    %82 = vector.broadcast %57 : vector<64x1xi32> to vector<64x512xi32>
    %83 = vector.broadcast %62 : vector<1x512xi32> to vector<64x512xi32>
    %84 = arith.cmpi eq, %82, %83 : vector<64x512xi32>
    %cst_24 = arith.constant 0.000000e+00 : f32
    %85 = vector.shape_cast %63 : vector<1x512xf32> to vector<1x512xf32>
    %86 = vector.broadcast %85 : vector<1x512xf32> to vector<64x512xf32>
    %87 = vector.broadcast %cst_24 : f32 to vector<64x512xf32>
    %88 = arith.select %84, %86, %87 : vector<64x512xi1>, vector<64x512xf32>
    %89 = vector.broadcast %57 : vector<64x1xi32> to vector<64x512xi32>
    %90 = vector.broadcast %68 : vector<1x512xi32> to vector<64x512xi32>
    %91 = arith.cmpi eq, %89, %90 : vector<64x512xi32>
    %cst_25 = arith.constant 0.000000e+00 : f32
    %92 = vector.shape_cast %69 : vector<1x512xf32> to vector<1x512xf32>
    %93 = vector.broadcast %92 : vector<1x512xf32> to vector<64x512xf32>
    %94 = vector.broadcast %cst_25 : f32 to vector<64x512xf32>
    %95 = arith.select %91, %93, %94 : vector<64x512xi1>, vector<64x512xf32>
    %96 = arith.addf %88, %95 : vector<64x512xf32>
    %97 = vector.broadcast %57 : vector<64x1xi32> to vector<64x512xi32>
    %98 = vector.broadcast %74 : vector<1x512xi32> to vector<64x512xi32>
    %99 = arith.cmpi eq, %97, %98 : vector<64x512xi32>
    %cst_26 = arith.constant 0.000000e+00 : f32
    %100 = vector.shape_cast %75 : vector<1x512xf32> to vector<1x512xf32>
    %101 = vector.broadcast %100 : vector<1x512xf32> to vector<64x512xf32>
    %102 = vector.broadcast %cst_26 : f32 to vector<64x512xf32>
    %103 = arith.select %99, %101, %102 : vector<64x512xi1>, vector<64x512xf32>
    %104 = arith.addf %96, %103 : vector<64x512xf32>
    %105 = vector.broadcast %57 : vector<64x1xi32> to vector<64x512xi32>
    %106 = vector.broadcast %80 : vector<1x512xi32> to vector<64x512xi32>
    %107 = arith.cmpi eq, %105, %106 : vector<64x512xi32>
    %cst_27 = arith.constant 0.000000e+00 : f32
    %108 = vector.shape_cast %81 : vector<1x512xf32> to vector<1x512xf32>
    %109 = vector.broadcast %108 : vector<1x512xf32> to vector<64x512xf32>
    %110 = vector.broadcast %cst_27 : f32 to vector<64x512xf32>
    %111 = arith.select %107, %109, %110 : vector<64x512xi1>, vector<64x512xf32>
    %112 = arith.addf %104, %111 : vector<64x512xf32>
    %113 = tpu.iota {dimensions = array<i32: 0>} : vector<8x1xi32>
    %114 = vector.broadcast %113 : vector<8x1xi32> to vector<8x512xi32>
    %115 = vector.broadcast %38 : vector<1x512xi32> to vector<8x512xi32>
    %116 = arith.cmpi eq, %114, %115 : vector<8x512xi32>
    %cst_28 = arith.constant 0.000000e+00 : f32
    %117 = vector.shape_cast %52 : vector<1x512xf32> to vector<1x512xf32>
    %118 = vector.broadcast %117 : vector<1x512xf32> to vector<8x512xf32>
    %119 = vector.broadcast %cst_28 : f32 to vector<8x512xf32>
    %120 = arith.select %116, %118, %119 : vector<8x512xi1>, vector<8x512xf32>
    %121 = vector.broadcast %113 : vector<8x1xi32> to vector<8x512xi32>
    %122 = vector.broadcast %56 : vector<1x512xi32> to vector<8x512xi32>
    %123 = arith.cmpi eq, %121, %122 : vector<8x512xi32>
    %cst_29 = arith.constant 0.000000e+00 : f32
    %124 = vector.shape_cast %37 : vector<1x512xf32> to vector<1x512xf32>
    %125 = vector.broadcast %124 : vector<1x512xf32> to vector<8x512xf32>
    %126 = vector.broadcast %cst_29 : f32 to vector<8x512xf32>
    %127 = arith.select %123, %125, %126 : vector<8x512xi1>, vector<8x512xf32>
    %128 = arith.addf %120, %127 : vector<8x512xf32>
    %129 = vector.shape_cast %112 : vector<64x512xf32> to vector<64x1x512xf32>
    %130 = vector.shape_cast %128 : vector<8x512xf32> to vector<1x8x512xf32>
    %131 = vector.broadcast %129 : vector<64x1x512xf32> to vector<64x8x512xf32>
    %132 = vector.broadcast %130 : vector<1x8x512xf32> to vector<64x8x512xf32>
    %133 = arith.mulf %131, %132 : vector<64x8x512xf32>
    %134 = vector.shape_cast %133 : vector<64x8x512xf32> to vector<512x512xf32>
    %c0_30 = arith.constant 0 : index
    %c0_31 = arith.constant 0 : index
    %135 = vector.load %arg6[%c0_30, %c0_31] : memref<512x512xf32, #tpu.memory_space<vmem>>, vector<512x512xf32>
    tpu.vector_store %arg6[%c0_30, %c0_31], %134 {strides = array<i32>} : memref<512x512xf32, #tpu.memory_space<vmem>>, vector<512x512xf32>,
    %c0_32 = arith.constant 0 : index
    %c0_33 = arith.constant 0 : index
    %c0_34 = arith.constant 0 : index
    %136 = vector.load %arg3[%c0_32, %c0_33, %c0_34] : memref<1x4x512xf32, #tpu.memory_space<vmem>>, vector<1x4x512xf32>
    %137 = vector.shape_cast %136 : vector<1x4x512xf32> to vector<4x512xf32>
    %c0_35 = arith.constant 0 : index
    %c0_36 = arith.constant 0 : index
    %138 = vector.load %arg6[%c0_35, %c0_36] : memref<512x512xf32, #tpu.memory_space<vmem>>, vector<512x512xf32>
    %cst_37 = arith.constant dense<0.000000e+00> : vector<4x512xf32>
    %139 = tpu.matmul %137, %138, %cst_37 {dimension_numbers = #tpu.dot_dimension_numbers<[1], [0], [0], [1], [0, 0, 1, 1], [], []>} : vector<4x512xf32>, vector<512x512xf32>, vector<4x512xf32> -> vector<4x512xf32>
    %c0_38 = arith.constant 0 : index
    %c0_39 = arith.constant 0 : index
    %c0_40 = arith.constant 0 : index
    %140 = vector.load %arg5[%c0_38, %c0_39, %c0_40] : memref<1x4x512xf32, #tpu.memory_space<vmem>>, vector<1x4x512xf32>
    %141 = vector.shape_cast %140 : vector<1x4x512xf32> to vector<4x512xf32>
    %142 = vector.shape_cast %139 : vector<4x512xf32> to vector<1x4x512xf32>
    tpu.vector_store %arg5[%c0_38, %c0_39, %c0_40], %142 {strides = array<i32>} : memref<1x4x512xf32, #tpu.memory_space<vmem>>, vector<1x4x512xf32>,
    return
  }
  func.func @transform_0(%arg0: i32, %arg1: i32, %arg2: i32) -> (i32, i32, i32) {
    %c0_i32 = arith.constant 0 : i32
    %c0_i32_0 = arith.constant 0 : i32
    return %arg0, %c0_i32, %arg2 : i32, i32, i32
  }
  func.func @transform_1(%arg0: i32, %arg1: i32, %arg2: i32) -> (i32, i32, i32) {
    %c0_i32 = arith.constant 0 : i32
    %c0_i32_0 = arith.constant 0 : i32
    return %arg0, %c0_i32, %arg1 : i32, i32, i32
  }
  func.func @transform_2(%arg0: i32, %arg1: i32, %arg2: i32) -> (i32, i32, i32) {
    %c0_i32 = arith.constant 0 : i32
    %c0_i32_0 = arith.constant 0 : i32
    return %arg0, %c0_i32, %arg1 : i32, i32, i32
  }
}

</mosaic_0001>

<bundles_post_ra>
// kernel: tpu_custom_call.1
= control target key start
LH: loop header
LB: loop body
LE: loop exit
PB: predicated region body
PF: predicated region fallthrough
CT: control target
= control target key end

     0   :  { %7 = vsyncpa [#allocation4], 0  ;;  %s4846_s0 = inlined_call_operand.vmem [shape: f32[2,4,512], index: 0, kind: input, shape index: {}]   ;;  %s4847_s1 = inlined_call_operand.vmem [shape: f32[2,3,512], index: 1, kind: input, shape index: {}]   ;;  %s4848_s2 = inlined_call_operand.hbm [shape: f32[2,4,512], index: 2, kind: output, shape index: {}]  }
   0x1   :  { %9 = vsyncpa [#allocation4 + $0x1], 0  ;;  %s3029_s9 = smov 0   ;;  %s3031_s10 = smov 0  }
   0x2   :  { %s3033_s11 = smov 0   ;;  %s3035_s12 = smov 0  }
   0x3   :  { %s3037_s13 = smov 0   ;;  %s3039_s14 = smov 0  }
   0x4 LB: > { %s2855_s15 = sadd.s32 4294967295, %s3012_s14   ;;  %s2856_s16 = sadd.s32 4294967294, %s3012_s14   ;;  %s3012_s14 = sphi %s3039_s14, %s15_s14   ;;  %s3008_s13 = sphi %s3037_s13, %s5150_s13   ;;  %s3004_s12 = sphi %s3035_s12, %s5149_s12   ;;  %s3000_s11 = sphi %s3033_s11, %s5148_s11   ;;  %s2996_s10 = sphi %s3031_s10, %s5147_s10   ;;  %s2992_s9 = sphi %s3029_s9, %s5146_s9  }
   0x5   : > { %s34_s17 = sadd.s32 1, %s3008_s13  ;;  %s99_s18 = sadd.s32 1, %s3000_s11 }
   0x6   : > { %p36_p0 = scmp.ge.s32.totalorder %s34_s17, 2  ;;  %p109_p1 = scmp.ne.s32.totalorder %s3000_s11, %s2996_s10 }
   0x7   : > { %p110_p2 = scmp.eq.s32.totalorder %s2855_s15, 1  ;;  %p115_p3 = scmp.ne.s32.totalorder %s2996_s10, %s2992_s9 }
   0x8   : > { %s5152_s17 = smov (%p36_p0, %s34_s17), 0  ;;  %p116_p5 = scmp.eq.s32.totalorder %s2856_s16, 1 }
   0x9   : > { %p3069_p4 = por %p110_p2, %p109_p1  ;;  %s94_s20 = ssub.s32 %s3008_s13, %s5152_s17 }
   0xa   : > { %p2859_p6 = scmp.ge.s32.totalorder %s3012_s14, 1  ;;  %p97_p7 = scmp.eq.s32.totalorder %s94_s20, 0 }
   0xb   : > { %p3076_p8 = por %p116_p5, %p115_p3  ;;  %p160_p9 = scmp.lt.s32.totalorder %s3012_s14, 3 }
   0xc   : > { %s3082_s22 = scalar_select %p97_p7, %s3000_s11, %s99_s18  }
   0xd   : > { %p161_p10 = pnand %p2859_p6, %p160_p9 }
   0xf   : > { %164 = sbr.rel (%p161_p10) target bundleno = 519 (0x207), region = 28 }
  0x14   : > { %p196_p11 = scmp.lt.s32.totalorder %s3004_s12, 1  ;;  %v241_v10 = vlaneseq  ;;  %s192_s3 = sand.u32 1, %s2996_s10  }
  0x15   : > { %s2860_s4 = sshll.u32 %s192_s3, 4  ;;  %s2872_s6 = sshll.u32 %s3004_s12, 4 }
  0x16   : > { %s3086_s23 = scalar_select %p196_p11, %s3004_s12, 1  ;;  %v3102_v17 = vshrl.u32 %v241_v10, 7 }
  0x17   : > { %s194_s5 = scalar_lea.vmem [#allocation3], %s2860_s4  ;;  %s2753_s15 = scalar_lea.hbm %s4848_s2, %s2872_s6 }
  0x18   : > { %s2870_s24 = sshll.u32 %s3086_s23, 4  ;;  %v3123_v30 = vadd.s32 40, %v3102_v17  ;;  %s2755_s16 = sshll.u32 %s194_s5, 4  ;;  %s2756_s16 = int_to_ptr.vmem [resolvable:$true] %s2755_s16 }
  0x19   : > { %s213_s27 = scalar_lea.vmem %s4847_s1, %s2870_s24  ;;  %s4268_s30 = scalar_lea.vmem %s4846_s0, %s2870_s24 }
  0x1a   : > { %v217_v0 = vld [vmem:[%s213_s27] sm:$0x77]  ;;  %v218_v1 = vld [vmem:[%s213_s27 + $0x8] sm:$0x77]  ;;  %s2757_s18 = sshll.u32 %s2753_s15, 4  ;;  %s2740_s12 = scalar_lea.sflag [#allocation4], %s192_s3  ;;  %s2758_s18 = int_to_ptr.hbm [resolvable:$true] %s2757_s18 }
  0x1b   : > { %v219_v2 = vadd.f32 1.0, %v217_v0  ;;  %v220_v3 = vadd.f32 1.0, %v218_v1  ;;  %s2948_s20 = sshra.s32 %s2758_s18, 4  ;;  %s2954_s26 = scalar_lea.hbm %s4848_s2, 32  ;;  %s2949_s20 = int_to_ptr.hbm [resolvable:$true] %s2948_s20 }
  0x1c   : > { %s2950_s23 = scalar_lea.hbm %s2949_s20, 16  ;;  %p2955_p1 = scmp.lt.s32.totalorder %s2949_s20, %s4848_s2 }
  0x1d   : > { %v221_v4 = vmul.f32 3.5, %v219_v2  ;;  %v222_v5 = vmul.f32 3.5, %v220_v3  ;;  %p2951_p12 = scmp.ne.s32.totalorder %s2949_s20, %s2950_s23  ;;  %p2956_p2 = scmp.lt.s32.totalorder %s2954_s26, %s2950_s23 }
  0x1f   : > { %v223_v6 = vmax.f32 %v221_v4, 0.0  ;;  %v224_v7 = vmax.f32 %v222_v5, 0.0  ;;  %p2952_p13 = pnand %p2951_p12, %p3069_p4  ;;  %p2957_p3 = por %p2956_p2, %p2955_p1 }
  0x21   : > { %v225_v8 = vmin.f32 %v223_v6, 7.0  ;;  %v226_v9 = vmin.f32 %v224_v7, 7.0  ;;  %p2953_p0 = pneg %p2952_p13 }
  0x23   : > { %v227_v11 = vfloor.f32 %v225_v8  ;;  %v228_v12 = vfloor.f32 %v226_v9  ;;  %p2958_p5 = pnand %p2957_p3, %p2953_p0 }
  0x25   : > { %v3094_v13 = vsub.f32 %v225_v8, %v227_v11  ;;  %v3096_v14 = vsub.f32 %v226_v9, %v228_v12  ;;  %v3098_v15 = vcvt.f32.s32 %v227_v11  ;;  %v3100_v16 = vcvt.f32.s32 %v228_v12 }
  0x27   : > { %v3105_v18 = vsub.f32 1.0, %v3094_v13  ;;  %v3108_v19 = vsub.f32 1.0, %v3096_v14  ;;  %v235_v20 = vadd.s32 1, %v3098_v15  ;;  %v236_v21 = vadd.s32 1, %v3100_v16 }
  0x28   : > { %v253_v22 = vmul.u32 8, %v3098_v15  ;;  %v254_v23 = vmul.u32 8, %v3100_v16  ;;  %v255_v24 = vrot.slane %v3098_v15, 7  ;;  %v256_v25 = vrot.slane %v3100_v16, 7 }
  0x29   : > { %vm237_vm0 = vcmp.lt.s32.totalorder %v235_v20, 7  ;;  %vm239_vm1 = vcmp.lt.s32.totalorder %v236_v21, 7  ;;  %v261_v26 = vrot.slane %v3105_v18, 7  ;;  %v262_v27 = vrot.slane %v3108_v19, 7 }
  0x2a   : > { %v3118_v28 = vsel %vm237_vm0, %v235_v20, 7  ;;  %v3120_v29 = vsel %vm239_vm1, %v236_v21, 7  ;;  %v257_v31 = vadd.s32 %v255_v24, %v253_v22  ;;  %v258_v32 = vadd.s32 %v256_v25, %v254_v23 }
  0x2b   : > { %v265_v33 = vmul.f32 %v261_v26, %v3105_v18  ;;  %v267_v34 = vrot.slane %v3118_v28, 7  ;;  %v268_v35 = vrot.slane %v3120_v29, 7  ;;  %v273_v36 = vrot.slane %v3094_v13, 7 }
  0x2c   : > { %v274_v37 = vrot.slane %v3096_v14, 7  ;;  %v281_v38 = vmul.u32 8, %v3118_v28  ;;  %v282_v39 = vmul.u32 8, %v3120_v29  ;;  %v266_v40 = vmul.f32 %v262_v27, %v3108_v19 }
  0x2d   : > { %v269_v41 = vadd.s32 %v267_v34, %v253_v22  ;;  %v270_v42 = vadd.s32 %v268_v35, %v254_v23  ;;  %v3134_v43 = vmul.f32 %v261_v26, %v3094_v13  ;;  %v277_v44 = vmul.f32 %v273_v36, %v3105_v18 }
  0x2e   : > { %v278_v45 = vmul.f32 %v274_v37, %v3108_v19  ;;  %v3138_v46 = vadd.s32 %v281_v38, %v255_v24  ;;  %v3141_v47 = vmul.f32 %v262_v27, %v3096_v14  ;;  %v3143_v48 = vadd.s32 %v282_v39, %v256_v25 }
  0x2f   : > { %v3145_v49 = vadd.s32 %v281_v38, %v267_v34  ;;  %v3147_v50 = vadd.s32 %v282_v39, %v268_v35  ;;  %v3150_v51 = vmul.f32 %v273_v36, %v3094_v13  ;;  %v291_v52 = vperm.slane %v257_v31, 2 }
  0x30   : > { %v292_v53 = vperm.slane %v257_v31, 6  ;;  %v293_v54 = vperm.slane %v258_v32, 2  ;;  %v294_v55 = vperm.slane %v258_v32, 6  ;;  %v333_v56 = vperm.slane %v265_v33, 2 }
  0x31   : > { %v334_v57 = vperm.slane %v265_v33, 6  ;;  %v335_v58 = vperm.slane %v266_v40, 2  ;;  %v336_v59 = vperm.slane %v266_v40, 6  ;;  %v3152_v60 = vperm.slane %v291_v52, 2 }
  0x32   : > { %v3154_v61 = vperm.slane %v292_v53, 2  ;;  %v3156_v62 = vperm.slane %v293_v54, 2  ;;  %v3158_v63 = vperm.slane %v294_v55, 2  ;;  %v3161_v0 = vmul.f32 %v274_v37, %v3096_v14 }
  0x33   : > { %v3163_v1 = vperm.slane %v333_v56, 2  ;;  %v3165_v2 = vperm.slane %v334_v57, 2  ;;  %v3167_v3 = vperm.slane %v335_v58, 2  ;;  %vm319_vm2 = vcmp.eq.s32.totalorder %v3123_v30, %v3152_v60 }
  0x34   : > { %vm320_vm3 = vcmp.eq.s32.totalorder %v3123_v30, %v3154_v61  ;;  %vm321_vm4 = vcmp.eq.s32.totalorder %v3123_v30, %v3156_v62  ;;  %v3175_v4 = vperm.slane %v336_v59, 2  ;;  %vm322_vm5 = vcmp.eq.s32.totalorder %v3123_v30, %v3158_v63 }
  0x35   : > { %v365_v5 = vsel %vm319_vm2, %v3163_v1, 0.0  ;;  %v366_v6 = vsel %vm320_vm3, %v3165_v2, 0.0  ;;  %v367_v7 = vsel %vm321_vm4, %v3167_v3, 0.0  ;;  %v377_v8 = vperm.slane %v269_v41, 2 }
  0x36   : > { %v378_v9 = vperm.slane %v269_v41, 6  ;;  %v379_v10 = vperm.slane %v270_v42, 2  ;;  %v380_v11 = vperm.slane %v270_v42, 6  ;;  %v419_v12 = vperm.slane %v277_v44, 2 }
  0x37   : > { %v420_v20 = vperm.slane %v277_v44, 6  ;;  %v421_v21 = vperm.slane %v278_v45, 2  ;;  %v422_v22 = vperm.slane %v278_v45, 6  ;;  %v3182_v23 = vperm.slane %v377_v8, 2 }
  0x38   : > { %v3184_v24 = vperm.slane %v378_v9, 2  ;;  %v3186_v25 = vperm.slane %v379_v10, 2  ;;  %v3188_v26 = vperm.slane %v380_v11, 2  ;;  %v3190_v27 = vperm.slane %v419_v12, 2 }
  0x39   : > { %v3192_v31 = vperm.slane %v420_v20, 2  ;;  %v3194_v32 = vperm.slane %v421_v21, 2  ;;  %v3196_v33 = vperm.slane %v422_v22, 2  ;;  %vm405_vm6 = vcmp.eq.s32.totalorder %v3123_v30, %v3182_v23 }
  0x3a   : > { %vm406_vm7 = vcmp.eq.s32.totalorder %v3123_v30, %v3184_v24  ;;  %vm407_vm8 = vcmp.eq.s32.totalorder %v3123_v30, %v3186_v25  ;;  %vm408_vm9 = vcmp.eq.s32.totalorder %v3123_v30, %v3188_v26  ;;  %v368_v34 = vsel %vm322_vm5, %v3175_v4, 0.0 }
  0x3b   : > { %v451_v35 = vsel %vm405_vm6, %v3190_v27, 0.0  ;;  %v452_v36 = vsel %vm406_vm7, %v3192_v31, 0.0  ;;  %v453_v37 = vsel %vm407_vm8, %v3194_v32, 0.0  ;;  %v454_v38 = vsel %vm408_vm9, %v3196_v33, 0.0 }
  0x3c   : > { %v483_v39 = vadd.f32 %v451_v35, %v365_v5  ;;  %v484_v40 = vadd.f32 %v452_v36, %v366_v6  ;;  %v485_v41 = vadd.f32 %v453_v37, %v367_v7  ;;  %v495_v42 = vperm.slane %v3138_v46, 2 }
  0x3d   : > { %v496_v44 = vperm.slane %v3138_v46, 6  ;;  %v497_v45 = vperm.slane %v3143_v48, 2  ;;  %v498_v52 = vperm.slane %v3143_v48, 6  ;;  %v537_v53 = vperm.slane %v3134_v43, 2 }
  0x3e   : > { %v538_v54 = vperm.slane %v3134_v43, 6  ;;  %v539_v55 = vperm.slane %v3141_v47, 2  ;;  %v540_v56 = vperm.slane %v3141_v47, 6  ;;  %v3222_v57 = vperm.slane %v495_v42, 2 }
  0x3f   : > { %v3224_v58 = vperm.slane %v496_v44, 2  ;;  %v3226_v59 = vperm.slane %v497_v45, 2  ;;  %v3228_v5 = vperm.slane %v498_v52, 2  ;;  %v3230_v46 = vperm.slane %v537_v53, 2 }
  0x40   : > { %v3232_v6 = vperm.slane %v538_v54, 2  ;;  %v3234_v48 = vperm.slane %v539_v55, 2  ;;  %v3236_v7 = vperm.slane %v540_v56, 2  ;;  %vm523_vm10 = vcmp.eq.s32.totalorder %v3123_v30, %v3222_v57 }
  0x41   : > { %vm524_vm11 = vcmp.eq.s32.totalorder %v3123_v30, %v3224_v58  ;;  %vm525_vm12 = vcmp.eq.s32.totalorder %v3123_v30, %v3226_v59  ;;  %vm526_vm13 = vcmp.eq.s32.totalorder %v3123_v30, %v3228_v5  ;;  %v486_v43 = vadd.f32 %v454_v38, %v368_v34 }
  0x42   : > { %v569_v47 = vsel %vm523_vm10, %v3230_v46, 0.0  ;;  %v570_v8 = vsel %vm524_vm11, %v3232_v6, 0.0  ;;  %v571_v9 = vsel %vm525_vm12, %v3234_v48, 0.0  ;;  %v572_v10 = vsel %vm526_vm13, %v3236_v7, 0.0 }
  0x43   : > { %v601_v11 = vadd.f32 %v569_v47, %v483_v39  ;;  %v602_v12 = vadd.f32 %v570_v8, %v484_v40  ;;  %v603_v20 = vadd.f32 %v571_v9, %v485_v41  ;;  %v613_v21 = vperm.slane %v3145_v49, 2 }
  0x44   : > { %v614_v22 = vperm.slane %v3145_v49, 6  ;;  %v615_v35 = vperm.slane %v3147_v50, 2  ;;  %v616_v36 = vperm.slane %v3147_v50, 6  ;;  %v655_v34 = vperm.slane %v3150_v51, 2 }
  0x45   : > { %v656_v37 = vperm.slane %v3150_v51, 6  ;;  %v657_v38 = vperm.slane %v3161_v0, 2  ;;  %v658_v42 = vperm.slane %v3161_v0, 6  ;;  %v3258_v44 = vperm.slane %v613_v21, 2 }
  0x46   : > { %v3260_v39 = vperm.slane %v614_v22, 2  ;;  %v3262_v40 = vperm.slane %v615_v35, 2  ;;  %v3264_v41 = vperm.slane %v616_v36, 2  ;;  %v3266_v49 = vperm.slane %v655_v34, 2 }
  0x47   : > { %v3268_v45 = vperm.slane %v656_v37, 2  ;;  %v3270_v50 = vperm.slane %v657_v38, 2  ;;  %v3272_v52 = vperm.slane %v658_v42, 2  ;;  %vm641_vm14 = vcmp.eq.s32.totalorder %v3123_v30, %v3258_v44 }
  0x48   : > { %vm642_vm15 = vcmp.eq.s32.totalorder %v3123_v30, %v3260_v39  ;;  %vm643_vm0 = vcmp.eq.s32.totalorder %v3123_v30, %v3262_v40  ;;  %vm644_vm1 = vcmp.eq.s32.totalorder %v3123_v30, %v3264_v41  ;;  %v604_v51 = vadd.f32 %v572_v10, %v486_v43 }
  0x49   : > { %4962 = vst [vmem:[#allocation6_spill] sm:$0xff] %v3272_v52  ;;  %v687_v0 = vsel %vm641_vm14, %v3266_v49, 0.0  ;;  %v688_v53 = vsel %vm642_vm15, %v3268_v45, 0.0  ;;  %v689_v54 = vsel %vm643_vm0, %v3270_v50, 0.0  ;;  %v690_v55 = vsel %vm644_vm1, %v3272_v52, 0.0 }
  0x4a   : > { %v3286_v56 = vadd.f32 %v687_v0, %v601_v11  ;;  %v720_v47 = vadd.f32 %v688_v53, %v602_v12  ;;  %v721_v8 = vadd.f32 %v689_v54, %v603_v20  ;;  %v731_v9 = vperm.slane %v3098_v15, 0 }
  0x4b   : > { %v732_v21 = vperm.slane %v3098_v15, 4  ;;  %v733_v22 = vperm.slane %v3100_v16, 0  ;;  %v734_v30 = vperm.slane %v3100_v16, 4  ;;  %v743_v43 = vperm.slane %v3105_v18, 0 }
  0x4c   : > { %v744_v10 = vperm.slane %v3105_v18, 4  ;;  %v745_v35 = vperm.slane %v3108_v19, 0  ;;  %v746_v36 = vperm.slane %v3108_v19, 4  ;;  %v735_v11 = vperm.slane %v731_v9, 0 }
  0x4d   : > { %v736_v34 = vperm.slane %v732_v21, 0  ;;  %v737_v12 = vperm.slane %v733_v22, 0  ;;  %v738_v20 = vperm.slane %v734_v30, 0  ;;  %v722_v37 = vadd.f32 %v690_v55, %v604_v51 }
  0x4e   : > { %v752_v38 = vperm.slane %v744_v10, 0  ;;  %v753_v42 = vperm.slane %v745_v35, 0  ;;  %v754_v15 = vperm.slane %v746_v36, 0  ;;  %v751_v16 = vperm.slane %v743_v43, 0 }
  0x4f   : > { %vm740_vm2 = vcmp.eq.s32.totalorder %v3102_v17, %v736_v34  ;;  %vm741_vm3 = vcmp.eq.s32.totalorder %v3102_v17, %v737_v12  ;;  %vm742_vm4 = vcmp.eq.s32.totalorder %v3102_v17, %v738_v20  ;;  %vm739_vm5 = vcmp.eq.s32.totalorder %v3102_v17, %v735_v11 }
  0x50   : > { %v756_v18 = vsel %vm740_vm2, %v752_v38, 0.0  ;;  %v757_v0 = vsel %vm741_vm3, %v753_v42, 0.0  ;;  %v758_v19 = vsel %vm742_vm4, %v754_v15, 0.0  ;;  %v759_v53 = vperm.slane %v3118_v28, 0 }
  0x51   : > { %v760_v54 = vperm.slane %v3118_v28, 4  ;;  %v761_v51 = vperm.slane %v3120_v29, 0  ;;  %v762_v55 = vperm.slane %v3120_v29, 4  ;;  %v771_v9 = vperm.slane %v3094_v13, 0 }
  0x52   : > { %v772_v21 = vperm.slane %v3094_v13, 4  ;;  %v773_v22 = vperm.slane %v3096_v14, 0  ;;  %v774_v30 = vperm.slane %v3096_v14, 4  ;;  %v763_v43 = vperm.slane %v759_v53, 0 }
  0x53   : > { %v764_v10 = vperm.slane %v760_v54, 0  ;;  %v765_v35 = vperm.slane %v761_v51, 0  ;;  %v766_v36 = vperm.slane %v762_v55, 0  ;;  %v779_v34 = vperm.slane %v771_v9, 0 }
  0x54   : > { %v780_v12 = vperm.slane %v772_v21, 0  ;;  %v781_v20 = vperm.slane %v773_v22, 0  ;;  %v782_v28 = vperm.slane %v774_v30, 0  ;;  %vm767_vm6 = vcmp.eq.s32.totalorder %v3102_v17, %v763_v43 }
  0x55   : > { %vm768_vm7 = vcmp.eq.s32.totalorder %v3102_v17, %v764_v10  ;;  %vm769_vm8 = vcmp.eq.s32.totalorder %v3102_v17, %v765_v35  ;;  %vm770_vm9 = vcmp.eq.s32.totalorder %v3102_v17, %v766_v36  ;;  %v755_v13 = vsel %vm739_vm5, %v751_v16, 0.0 }
  0x56   : > { %v784_v14 = vsel %vm768_vm7, %v780_v12, 0.0  ;;  %v785_v29 = vsel %vm769_vm8, %v781_v20, 0.0  ;;  %v786_v38 = vsel %vm770_vm9, %v782_v28, 0.0  ;;  %v783_v42 = vsel %vm767_vm6, %v779_v34, 0.0 }
  0x57   : > { %v3314_v15 = vadd.f32 %v784_v14, %v756_v18  ;;  %v3316_v53 = vadd.f32 %v785_v29, %v757_v0  ;;  %v3318_v54 = vadd.f32 %v786_v38, %v758_v19  ;;  %v3320_v51 = vrot.slane %v720_v47, 7 }
  0x58   : > { %v3322_v55 = vrot.slane %v721_v8, 6  ;;  %v3324_v9 = vrot.slane %v722_v37, 5  ;;  %vm853_vm10 = vcmask 1041409   ;;  %vm879_vm11 = vcmask 1046528  }
  0x59   : > { %4963 = vst [vmem:[#allocation7_spill] sm:$0xff] %v3314_v15  ;;  %vm891_vm12 = vcmask 1046529   ;;  %vm847_vm13 = vcmask 1040384   ;;  %vm873_vm14 = vcmask 1046534   ;;  %v1045_v11 = vsel %vm879_vm11, %v3320_v51, %v3286_v56 }
  0x5a   : > { %4964 = vst [vmem:[#allocation8_spill] sm:$0xff] %v3316_v53  ;;  %v1046_v16 = vsel %vm853_vm10, %v3322_v55, %v3324_v9  ;;  %vm886_vm15 = vcmask 1045504   ;;  %v1041_v47 = vsel %vm873_vm14, %v3286_v56, %v3320_v51  ;;  %v3335_v8 = vadd.f32 %v783_v42, %v755_v13 }
  0x5b   : > { %4965 = vst [vmem:[#allocation9_spill] sm:$0xff] %v3318_v54  ;;  %v1047_v37 = vsel %vm891_vm12, %v1046_v16, %v1045_v11  ;;  %v1042_v18 = vsel %vm847_vm13, %v3322_v55, %v3324_v9  ;;  %v249_v0 = vadd.s32 56, %v3102_v17  ;;  %v3346_v22 = vadd.s32 8, %v3102_v17 }
  0x5c   : > { %v3342_v19 = vrot.slane %v1047_v37, 7  ;;  %v1043_v21 = vsel %vm886_vm15, %v1042_v18, %v1041_v47  ;;  %v3349_v30 = vadd.s32 24, %v3102_v17 }
  0x5d   : > { %v3351_v43 = vrot.slane %v1043_v21, 6  ;;  %vm327_vm0 = vcmp.eq.s32.totalorder %v249_v0, %v3152_v60  ;;  %vm328_vm1 = vcmp.eq.s32.totalorder %v249_v0, %v3154_v61  ;;  %vm329_vm2 = vcmp.eq.s32.totalorder %v249_v0, %v3156_v62 }
  0x5e   : > { %4966 = vst [vmem:[#allocation10_spill] sm:$0xff] %v3342_v19  ;;  %v1299_v10 = vperm.slane %v3342_v19, 0  ;;  %vm330_vm3 = vcmp.eq.s32.totalorder %v249_v0, %v3158_v63  ;;  %v373_v35 = vsel %vm327_vm0, %v3163_v1, 0.0  ;;  %v374_v36 = vsel %vm328_vm1, %v3165_v2, 0.0 }
  0x5f   : > { %4967 = vst [vmem:[#allocation11_spill] sm:$0xff] %v3351_v43  ;;  %v1295_v34 = vperm.slane %v3351_v43, 0  ;;  %v375_v12 = vsel %vm329_vm2, %v3167_v3, 0.0  ;;  %v376_v20 = vsel %vm330_vm3, %v3175_v4, 0.0  ;;  %vm413_vm4 = vcmp.eq.s32.totalorder %v249_v0, %v3182_v23 }
  0x60   : > { %v1811_v28 = vmul.f32 %v1299_v10, %v3335_v8  ;;  %vm414_vm5 = vcmp.eq.s32.totalorder %v249_v0, %v3184_v24  ;;  %vm415_vm6 = vcmp.eq.s32.totalorder %v249_v0, %v3186_v25  ;;  %vm416_vm7 = vcmp.eq.s32.totalorder %v249_v0, %v3188_v26 }
  0x61   : > { %v1807_v13 = vmul.f32 %v1295_v34, %v3335_v8  ;;  %v459_v14 = vsel %vm413_vm4, %v3190_v27, 0.0  ;;  %v460_v29 = vsel %vm414_vm5, %v3192_v31, 0.0  ;;  %v461_v38 = vsel %vm415_vm6, %v3194_v32, 0.0 }
  0x62   : > { %2446 = vmatpush.msra.mxu2 %v1811_v28  ;;  %v462_v42 = vsel %vm416_vm7, %v3196_v33, 0.0  ;;  %v491_v11 = vadd.f32 %v459_v14, %v373_v35  ;;  %v492_v16 = vadd.f32 %v460_v29, %v374_v36  ;;  %v493_v47 = vadd.f32 %v461_v38, %v375_v12 }
  0x63   : > { %v494_v37 = vadd.f32 %v462_v42, %v376_v20  ;;  %vm531_vm8 = vcmp.eq.s32.totalorder %v249_v0, %v3222_v57  ;;  %vm532_vm9 = vcmp.eq.s32.totalorder %v249_v0, %v3224_v58  ;;  %vm533_vm0 = vcmp.eq.s32.totalorder %v249_v0, %v3226_v59 }
  0x64   : > { %2447 = vmatpush.msra.mxu2 %v1807_v13  ;;  %vm534_vm1 = vcmp.eq.s32.totalorder %v249_v0, %v3228_v5  ;;  %v577_v18 = vsel %vm531_vm8, %v3230_v46, 0.0  ;;  %v578_v21 = vsel %vm532_vm9, %v3232_v6, 0.0  ;;  %v579_v10 = vsel %vm533_vm0, %v3234_v48, 0.0 }
  0x65   : > { %v580_v35 = vsel %vm534_vm1, %v3236_v7, 0.0  ;;  %v609_v36 = vadd.f32 %v577_v18, %v491_v11  ;;  %v610_v34 = vadd.f32 %v578_v21, %v492_v16  ;;  %v611_v12 = vadd.f32 %v579_v10, %v493_v47 }
  0x66   : > { %v612_v20 = vadd.f32 %v580_v35, %v494_v37  ;;  %vm649_vm2 = vcmp.eq.s32.totalorder %v249_v0, %v3258_v44  ;;  %vm650_vm3 = vcmp.eq.s32.totalorder %v249_v0, %v3260_v39  ;;  %vm651_vm4 = vcmp.eq.s32.totalorder %v249_v0, %v3262_v40 }
  0x67   : > { %vm652_vm5 = vcmp.eq.s32.totalorder %v249_v0, %v3264_v41  ;;  %v695_v28 = vsel %vm649_vm2, %v3266_v49, 0.0  ;;  %v696_v13 = vsel %vm650_vm3, %v3268_v45, 0.0  ;;  %v697_v14 = vsel %vm651_vm4, %v3270_v50, 0.0 }
  0x68   : > { %v698_v29 = vsel %vm652_vm5, %v3272_v52, 0.0  ;;  %v3389_v38 = vadd.f32 %v695_v28, %v609_v36  ;;  %v728_v42 = vadd.f32 %v696_v13, %v610_v34  ;;  %v729_v11 = vadd.f32 %v697_v14, %v611_v12 }
  0x69   : > { %v730_v16 = vadd.f32 %v698_v29, %v612_v20  ;;  %vm303_vm6 = vcmp.eq.s32.totalorder %v3346_v22, %v3152_v60  ;;  %vm304_vm7 = vcmp.eq.s32.totalorder %v3346_v22, %v3154_v61  ;;  %vm305_vm8 = vcmp.eq.s32.totalorder %v3346_v22, %v3156_v62 }
  0x6a   : > { %v3397_v0 = vrot.slane %v728_v42, 7  ;;  %v3399_v47 = vrot.slane %v729_v11, 6  ;;  %vm306_vm9 = vcmp.eq.s32.totalorder %v3346_v22, %v3158_v63  ;;  %v349_v37 = vsel %vm303_vm6, %v3163_v1, 0.0 }
  0x6b   : > { %v3404_v18 = vrot.slane %v730_v16, 5  ;;  %v350_v21 = vsel %vm304_vm7, %v3165_v2, 0.0  ;;  %v351_v10 = vsel %vm305_vm8, %v3167_v3, 0.0  ;;  %v352_v35 = vsel %vm306_vm9, %v3175_v4, 0.0 }
  0x6c   : > { %v1107_v36 = vsel %vm879_vm11, %v3397_v0, %v3389_v38  ;;  %vm389_vm0 = vcmp.eq.s32.totalorder %v3346_v22, %v3182_v23  ;;  %vm390_vm1 = vcmp.eq.s32.totalorder %v3346_v22, %v3184_v24  ;;  %vm391_vm2 = vcmp.eq.s32.totalorder %v3346_v22, %v3186_v25 }
  0x6d   : > { %v1108_v34 = vsel %vm853_vm10, %v3399_v47, %v3404_v18  ;;  %vm392_vm3 = vcmp.eq.s32.totalorder %v3346_v22, %v3188_v26  ;;  %v435_v12 = vsel %vm389_vm0, %v3190_v27, 0.0  ;;  %v436_v20 = vsel %vm390_vm1, %v3192_v31, 0.0 }
  0x6e   : > { %v1109_v28 = vsel %vm891_vm12, %v1108_v34, %v1107_v36  ;;  %v437_v13 = vsel %vm391_vm2, %v3194_v32, 0.0  ;;  %v438_v14 = vsel %vm392_vm3, %v3196_v33, 0.0  ;;  %v467_v29 = vadd.f32 %v435_v12, %v349_v37 }
  0x6f   : > { %v3428_v42 = vrot.slane %v1109_v28, 7  ;;  %v468_v11 = vadd.f32 %v436_v20, %v350_v21  ;;  %v469_v16 = vadd.f32 %v437_v13, %v351_v10  ;;  %v470_v54 = vadd.f32 %v438_v14, %v352_v35 }
  0x70   : > { %vm507_vm4 = vcmp.eq.s32.totalorder %v3346_v22, %v3222_v57  ;;  %vm508_vm5 = vcmp.eq.s32.totalorder %v3346_v22, %v3224_v58  ;;  %vm509_vm6 = vcmp.eq.s32.totalorder %v3346_v22, %v3226_v59  ;;  %vm510_vm7 = vcmp.eq.s32.totalorder %v3346_v22, %v3228_v5 }
  0x71   : > { %4968 = vst [vmem:[#allocation12_spill] sm:$0xff] %v3428_v42  ;;  %v1363_v36 = vperm.slane %v3428_v42, 0  ;;  %v553_v37 = vsel %vm507_vm4, %v3230_v46, 0.0  ;;  %v554_v21 = vsel %vm508_vm5, %v3232_v6, 0.0  ;;  %v555_v10 = vsel %vm509_vm6, %v3234_v48, 0.0 }
  0x72   : > { %v556_v35 = vsel %vm510_vm7, %v3236_v7, 0.0  ;;  %v585_v34 = vadd.f32 %v553_v37, %v467_v29  ;;  %v586_v12 = vadd.f32 %v554_v21, %v468_v11  ;;  %v587_v20 = vadd.f32 %v555_v10, %v469_v16 }
  0x73   : > { %v1875_v28 = vmul.f32 %v1363_v36, %v3335_v8  ;;  %v588_v13 = vadd.f32 %v556_v35, %v470_v54  ;;  %vm625_vm8 = vcmp.eq.s32.totalorder %v3346_v22, %v3258_v44  ;;  %vm626_vm9 = vcmp.eq.s32.totalorder %v3346_v22, %v3260_v39 }
  0x74   : > { %vm627_vm0 = vcmp.eq.s32.totalorder %v3346_v22, %v3262_v40  ;;  %vm628_vm1 = vcmp.eq.s32.totalorder %v3346_v22, %v3264_v41  ;;  %v671_v14 = vsel %vm625_vm8, %v3266_v49, 0.0  ;;  %v672_v29 = vsel %vm626_vm9, %v3268_v45, 0.0 }
  0x75   : > { %2466 = vmatpush.msra.mxu3 %v1875_v28  ;;  %v673_v11 = vsel %vm627_vm0, %v3270_v50, 0.0  ;;  %v674_v54 = vsel %vm628_vm1, %v3272_v52, 0.0  ;;  %v3456_v16 = vadd.f32 %v671_v14, %v585_v34  ;;  %v704_v36 = vadd.f32 %v672_v29, %v586_v12 }
  0x76   : > { %v705_v37 = vadd.f32 %v673_v11, %v587_v20  ;;  %v706_v21 = vadd.f32 %v674_v54, %v588_v13  ;;  %vm311_vm2 = vcmp.eq.s32.totalorder %v3349_v30, %v3152_v60  ;;  %vm312_vm3 = vcmp.eq.s32.totalorder %v3349_v30, %v3154_v61 }
  0x77   : > { %v3462_v22 = vrot.slane %v704_v36, 7  ;;  %vm313_vm4 = vcmp.eq.s32.totalorder %v3349_v30, %v3156_v62  ;;  %vm314_vm5 = vcmp.eq.s32.totalorder %v3349_v30, %v3158_v63  ;;  %v357_v10 = vsel %vm311_vm2, %v3163_v1, 0.0 }
  0x78   : > { %v3469_v35 = vrot.slane %v705_v37, 6  ;;  %v3471_v34 = vrot.slane %v706_v21, 5  ;;  %v358_v12 = vsel %vm312_vm3, %v3165_v2, 0.0  ;;  %v359_v20 = vsel %vm313_vm4, %v3167_v3, 0.0 }
  0x79   : > { %v921_v28 = vsel %vm879_vm11, %v3462_v22, %v3456_v16  ;;  %v360_v13 = vsel %vm314_vm5, %v3175_v4, 0.0  ;;  %vm397_vm6 = vcmp.eq.s32.totalorder %v3349_v30, %v3182_v23  ;;  %vm398_vm7 = vcmp.eq.s32.totalorder %v3349_v30, %v3184_v24 }
  0x7a   : > { %v922_v14 = vsel %vm853_vm10, %v3469_v35, %v3471_v34  ;;  %vm399_vm8 = vcmp.eq.s32.totalorder %v3349_v30, %v3186_v25  ;;  %vm400_vm9 = vcmp.eq.s32.totalorder %v3349_v30, %v3188_v26  ;;  %v443_v29 = vsel %vm397_vm6, %v3190_v27, 0.0 }
  0x7b   : > { %v923_v11 = vsel %vm891_vm12, %v922_v14, %v921_v28  ;;  %v444_v54 = vsel %vm398_vm7, %v3192_v31, 0.0  ;;  %v445_v36 = vsel %vm399_vm8, %v3194_v32, 0.0  ;;  %v446_v37 = vsel %vm400_vm9, %v3196_v33, 0.0 }
  0x7c   : > { %v3495_v21 = vrot.slane %v923_v11, 7  ;;  %v475_v53 = vadd.f32 %v443_v29, %v357_v10  ;;  %v476_v42 = vadd.f32 %v444_v54, %v358_v12  ;;  %v477_v43 = vadd.f32 %v445_v36, %v359_v20 }
  0x7d   : > { %v478_v15 = vadd.f32 %v446_v37, %v360_v13  ;;  %vm515_vm0 = vcmp.eq.s32.totalorder %v3349_v30, %v3222_v57  ;;  %vm516_vm1 = vcmp.eq.s32.totalorder %v3349_v30, %v3224_v58  ;;  %vm517_vm2 = vcmp.eq.s32.totalorder %v3349_v30, %v3226_v59 }
  0x7e   : > { %4969 = vst [vmem:[#allocation13_spill] sm:$0xff] %v3495_v21  ;;  %v1171_v28 = vperm.slane %v3495_v21, 0  ;;  %vm518_vm3 = vcmp.eq.s32.totalorder %v3349_v30, %v3228_v5  ;;  %v561_v14 = vsel %vm515_vm0, %v3230_v46, 0.0  ;;  %v562_v10 = vsel %vm516_vm1, %v3232_v6, 0.0 }
  0x7f   : > { %v563_v12 = vsel %vm517_vm2, %v3234_v48, 0.0  ;;  %v564_v20 = vsel %vm518_vm3, %v3236_v7, 0.0  ;;  %v593_v13 = vadd.f32 %v561_v14, %v475_v53  ;;  %v594_v29 = vadd.f32 %v562_v10, %v476_v42 }
  0x80   : > { %v1683_v11 = vmul.f32 %v1171_v28, %v3335_v8  ;;  %v595_v54 = vadd.f32 %v563_v12, %v477_v43  ;;  %v596_v36 = vadd.f32 %v564_v20, %v478_v15  ;;  %vm633_vm4 = vcmp.eq.s32.totalorder %v3349_v30, %v3258_v44 }
  0x81   : > { %vm634_vm5 = vcmp.eq.s32.totalorder %v3349_v30, %v3260_v39  ;;  %vm635_vm6 = vcmp.eq.s32.totalorder %v3349_v30, %v3262_v40  ;;  %vm636_vm7 = vcmp.eq.s32.totalorder %v3349_v30, %v3264_v41  ;;  %v679_v37 = vsel %vm633_vm4, %v3266_v49, 0.0 }
  0x82   : > { %2406 = vmatpush.msra.mxu0 %v1683_v11  ;;  %v680_v53 = vsel %vm634_vm5, %v3268_v45, 0.0  ;;  %v681_v43 = vsel %vm635_vm6, %v3270_v50, 0.0  ;;  %v682_v15 = vsel %vm636_vm7, %v3272_v52, 0.0  ;;  %v3523_v42 = vadd.f32 %v679_v37, %v593_v13 }
  0x83   : > { %v712_v28 = vadd.f32 %v680_v53, %v594_v29  ;;  %v713_v14 = vadd.f32 %v681_v43, %v595_v54  ;;  %v714_v10 = vadd.f32 %v682_v15, %v596_v36  ;;  %vm4905_vm8 = vcmask 1045509  }
  0x84   : > { %vm4904_vm9 = vcmask 1046533   ;;  %v1037_v30 = vsel %vm4905_vm8, %v3286_v56, %v3320_v51  ;;  %v1038_v12 = vsel %vm879_vm11, %v3324_v9, %v3322_v55  ;;  %v1103_v20 = vsel %vm873_vm14, %v3389_v38, %v3397_v0 }
  0x85   : > { %v3534_v11 = vrot.slane %v712_v28, 7  ;;  %v3536_v13 = vrot.slane %v713_v14, 6  ;;  %v3538_v29 = vrot.slane %v714_v10, 5  ;;  %v1039_v54 = vsel %vm4904_vm9, %v1037_v30, %v1038_v12 }
  0x86   : > { %v3541_v36 = vrot.slane %v1039_v54, 5  ;;  %v1104_v37 = vsel %vm847_vm13, %v3399_v47, %v3404_v18  ;;  %v917_v53 = vsel %vm873_vm14, %v3456_v16, %v3462_v22  ;;  %v918_v43 = vsel %vm847_vm13, %v3469_v35, %v3471_v34 }
  0x87   : > { %v983_v15 = vsel %vm879_vm11, %v3534_v11, %v3523_v42  ;;  %v984_v28 = vsel %vm853_vm10, %v3536_v13, %v3538_v29  ;;  %v1105_v14 = vsel %vm886_vm15, %v1104_v37, %v1103_v20  ;;  %v919_v10 = vsel %vm886_vm15, %v918_v43, %v917_v53 }
  0x88   : > { %4970 = vst [vmem:[#allocation14_spill] sm:$0xff] %v3541_v36  ;;  %v985_v30 = vsel %vm891_vm12, %v984_v28, %v983_v15  ;;  %v1291_v12 = vperm.slane %v3541_v36, 0  ;;  %v3562_v54 = vrot.slane %v1105_v14, 6  ;;  %v3564_v21 = vrot.slane %v919_v10, 6 }
  0x89   : > { %v3566_v19 = vrot.slane %v985_v30, 7  ;;  %v979_v52 = vsel %vm873_vm14, %v3523_v42, %v3534_v11  ;;  %v980_v20 = vsel %vm847_vm13, %v3536_v13, %v3538_v29  ;;  %vm4903_vm0 = vcmask 1044484  }
  0x8a   : > { %4971 = vst [vmem:[#allocation15_spill] sm:$0xff] %v3562_v54  ;;  %v1803_v37 = vmul.f32 %v1291_v12, %v3335_v8  ;;  %v1359_v53 = vperm.slane %v3562_v54, 0  ;;  %v1167_v43 = vperm.slane %v3564_v21, 0  ;;  %v981_v15 = vsel %vm886_vm15, %v980_v20, %v979_v52 }
  0x8b   : > { %4972 = vst [vmem:[#allocation16_spill] sm:$0xff] %v3564_v21  ;;  %v1235_v28 = vperm.slane %v3566_v19, 0  ;;  %v3579_v14 = vrot.slane %v981_v15, 6  ;;  %vm4902_vm1 = vcmask 1045508   ;;  %v1033_v10 = vsel %vm4903_vm0, %v3286_v56, %v3320_v51 }
  0x8c   : > { %4973 = vst [vmem:[#allocation17_spill] sm:$0xff] %v3566_v19  ;;  %2448 = vmatpush.msra.mxu2 %v1803_v37  ;;  %v1871_v30 = vmul.f32 %v1359_v53, %v3335_v8  ;;  %v1679_v12 = vmul.f32 %v1167_v43, %v3335_v8  ;;  %v1034_v21 = vsel %vm873_vm14, %v3322_v55, %v3324_v9  ;;  %vm4901_vm2 = vcmask 1043459  }
  0x8d   : > { %4974 = vst [vmem:[#allocation18_spill] sm:$0xff] %v3579_v14  ;;  %v1099_v52 = vsel %vm4905_vm8, %v3389_v38, %v3397_v0  ;;  %v1747_v20 = vmul.f32 %v1235_v28, %v3335_v8  ;;  %v1231_v15 = vperm.slane %v3579_v14, 0  ;;  %v1035_v54 = vsel %vm4902_vm1, %v1033_v10, %v1034_v21 }
  0x8e   : > { %v1100_v37 = vsel %vm879_vm11, %v3404_v18, %v3399_v47  ;;  %2467 = vmatpush.msra.mxu3 %v1871_v30  ;;  %2407 = vmatpush.msra.mxu0 %v1679_v12  ;;  %v3598_v53 = vrot.slane %v1035_v54, 4  ;;  %v913_v36 = vsel %vm4905_vm8, %v3456_v16, %v3462_v22  ;;  %v914_v28 = vsel %vm879_vm11, %v3471_v34, %v3469_v35 }
  0x8f   : > { %v1101_v43 = vsel %vm4904_vm9, %v1099_v52, %v1100_v37  ;;  %2426 = vmatpush.msra.mxu1 %v1747_v20  ;;  %v1743_v21 = vmul.f32 %v1231_v15, %v3335_v8  ;;  %v915_v30 = vsel %vm4904_vm9, %v913_v36, %v914_v28  ;;  %v975_v54 = vsel %vm4905_vm8, %v3523_v42, %v3534_v11 }
  0x90   : > { %4975 = vst [vmem:[#allocation19_spill] sm:$0xff] %v3598_v53  ;;  %v3608_v10 = vrot.slane %v1101_v43, 5  ;;  %v1287_v12 = vperm.slane %v3598_v53, 0  ;;  %v3615_v52 = vrot.slane %v915_v30, 5  ;;  %v976_v37 = vsel %vm879_vm11, %v3538_v29, %v3536_v13 }
  0x91   : > { %2427 = vmatpush.msra.mxu1 %v1743_v21  ;;  %v977_v15 = vsel %vm4904_vm9, %v975_v54, %v976_v37  ;;  %vm4900_vm3 = vcmask 1044483   ;;  %v1029_v36 = vsel %vm4901_vm2, %v3286_v56, %v3320_v51  ;;  %v1030_v53 = vsel %vm4905_vm8, %v3322_v55, %v3324_v9 }
  0x92   : > { %4976 = vst [vmem:[#allocation20_spill] sm:$0xff] %v3608_v10  ;;  %v1355_v20 = vperm.slane %v3608_v10, 0  ;;  %v1799_v43 = vmul.f32 %v1287_v12, %v3335_v8  ;;  %v1163_v28 = vperm.slane %v3615_v52, 0  ;;  %v3627_v30 = vrot.slane %v977_v15, 5 }
  0x93   : > { %4977 = vst [vmem:[#allocation21_spill] sm:$0xff] %v3615_v52  ;;  %v1031_v10 = vsel %vm4900_vm3, %v1029_v36, %v1030_v53  ;;  %v1095_v54 = vsel %vm4903_vm0, %v3389_v38, %v3397_v0  ;;  %v1096_v12 = vsel %vm873_vm14, %v3399_v47, %v3404_v18  ;;  %v909_v53 = vsel %vm4903_vm0, %v3456_v16, %v3462_v22 }
  0x94   : > { %4978 = vst [vmem:[#allocation22_spill] sm:$0xff] %v3627_v30  ;;  %v1867_v21 = vmul.f32 %v1355_v20, %v3335_v8  ;;  %2449 = vmatpush.msra.mxu2 %v1799_v43  ;;  %v1675_v37 = vmul.f32 %v1163_v28, %v3335_v8  ;;  %v1227_v15 = vperm.slane %v3627_v30, 0  ;;  %v3642_v52 = vrot.slane %v1031_v10, 3 }
  0x95   : > { %v1097_v14 = vsel %vm4902_vm1, %v1095_v54, %v1096_v12  ;;  %v910_v36 = vsel %vm873_vm14, %v3469_v35, %v3471_v34  ;;  %v971_v43 = vsel %vm4903_vm0, %v3523_v42, %v3534_v11  ;;  %vm849_vm4 = vcmask 1042434  }
  0x96   : > { %4979 = vst [vmem:[#allocation23_spill] sm:$0xff] %v3642_v52  ;;  %2468 = vmatpush.msra.mxu3 %v1867_v21  ;;  %v3645_v20 = vrot.slane %v1097_v14, 4  ;;  %2408 = vmatpush.msra.mxu0 %v1675_v37  ;;  %v1739_v10 = vmul.f32 %v1227_v15, %v3335_v8  ;;  %v1283_v28 = vperm.slane %v3642_v52, 0  ;;  %v911_v14 = vsel %vm4902_vm1, %v909_v53, %v910_v36 }
  0x97   : > { %v972_v21 = vsel %vm873_vm14, %v3536_v13, %v3538_v29  ;;  %v3663_v12 = vrot.slane %v911_v14, 4  ;;  %vm4899_vm5 = vcmask 1043458   ;;  %v1025_v15 = vsel %vm849_vm4, %v3286_v56, %v3320_v51 }
  0x98   : > { %4980 = vst [vmem:[#allocation24_spill] sm:$0xff] %v3645_v20  ;;  %v1351_v54 = vperm.slane %v3645_v20, 0  ;;  %v973_v30 = vsel %vm4902_vm1, %v971_v43, %v972_v21  ;;  %2428 = vmatpush.msra.mxu1 %v1739_v10  ;;  %v1795_v37 = vmul.f32 %v1283_v28, %v3335_v8  ;;  %v1026_v14 = vsel %vm4903_vm0, %v3322_v55, %v3324_v9 }
  0x99   : > { %4981 = vst [vmem:[#allocation25_spill] sm:$0xff] %v3663_v12  ;;  %v3667_v19 = vrot.slane %v973_v30, 4  ;;  %v1159_v36 = vperm.slane %v3663_v12, 0  ;;  %v1091_v43 = vsel %vm4901_vm2, %v3389_v38, %v3397_v0  ;;  %v1027_v10 = vsel %vm4899_vm5, %v1025_v15, %v1026_v14 }
  0x9a   : > { %v1863_v53 = vmul.f32 %v1351_v54, %v3335_v8  ;;  %2450 = vmatpush.msra.mxu2 %v1795_v37  ;;  %v1092_v28 = vsel %vm4905_vm8, %v3399_v47, %v3404_v18  ;;  %v905_v21 = vsel %vm4901_vm2, %v3456_v16, %v3462_v22  ;;  %v3689_v12 = vrot.slane %v1027_v10, 2 }
  0x9b   : > { %4982 = vst [vmem:[#allocation26_spill] sm:$0xff] %v3667_v19  ;;  %v1223_v30 = vperm.slane %v3667_v19, 0  ;;  %v1671_v54 = vmul.f32 %v1159_v36, %v3335_v8  ;;  %v1093_v20 = vsel %vm4900_vm3, %v1091_v43, %v1092_v28  ;;  %v906_v37 = vsel %vm4905_vm8, %v3469_v35, %v3471_v34 }
  0x9c   : > { %2469 = vmatpush.msra.mxu3 %v1863_v53  ;;  %4983 = vst [vmem:[#allocation27_spill] sm:$0xff] %v3689_v12  ;;  %v3696_v14 = vrot.slane %v1093_v20, 3  ;;  %v907_v19 = vsel %vm4900_vm3, %v905_v21, %v906_v37  ;;  %v967_v53 = vsel %vm4901_vm2, %v3523_v42, %v3534_v11  ;;  %v1279_v36 = vperm.slane %v3689_v12, 0 }
  0x9d   : > { %v1735_v15 = vmul.f32 %v1223_v30, %v3335_v8  ;;  %2409 = vmatpush.msra.mxu0 %v1671_v54  ;;  %v3703_v10 = vrot.slane %v907_v19, 3  ;;  %v968_v43 = vsel %vm4905_vm8, %v3536_v13, %v3538_v29  ;;  %vm4898_vm6 = vcmask 1042433  }
  0x9e   : > { %4984 = vst [vmem:[#allocation28_spill] sm:$0xff] %v3696_v14  ;;  %v1347_v20 = vperm.slane %v3696_v14, 0  ;;  %v969_v30 = vsel %vm4900_vm3, %v967_v53, %v968_v43  ;;  %v1021_v28 = vsel %vm853_vm10, %v3286_v56, %v3320_v51  ;;  %v1022_v21 = vsel %vm4901_vm2, %v3322_v55, %v3324_v9 }
  0x9f   : > { %4985 = vst [vmem:[#allocation29_spill] sm:$0xff] %v3703_v10  ;;  %2429 = vmatpush.msra.mxu1 %v1735_v15  ;;  %v1791_v19 = vmul.f32 %v1279_v36, %v3335_v8  ;;  %v1155_v54 = vperm.slane %v3703_v10, 0  ;;  %v3718_v37 = vrot.slane %v969_v30, 3  ;;  %v1023_v15 = vsel %vm4898_vm6, %v1021_v28, %v1022_v21 }
  0xa0   : > { %v1859_v14 = vmul.f32 %v1347_v20, %v3335_v8  ;;  %v3722_v12 = vrot.slane %v1023_v15, 1  ;;  %v1087_v53 = vsel %vm849_vm4, %v3389_v38, %v3397_v0  ;;  %v1088_v43 = vsel %vm4903_vm0, %v3399_v47, %v3404_v18 }
  0xa1   : > { %4986 = vst [vmem:[#allocation30_spill] sm:$0xff] %v3718_v37  ;;  %2451 = vmatpush.msra.mxu2 %v1791_v19  ;;  %v1667_v36 = vmul.f32 %v1155_v54, %v3335_v8  ;;  %v1219_v30 = vperm.slane %v3718_v37, 0  ;;  %v1089_v10 = vsel %vm4899_vm5, %v1087_v53, %v1088_v43  ;;  %v901_v20 = vsel %vm849_vm4, %v3456_v16, %v3462_v22 }
  0xa2   : > { %4987 = vst [vmem:[#allocation31_spill] sm:$0xff] %v3722_v12  ;;  %2470 = vmatpush.msra.mxu3 %v1859_v14  ;;  %v1275_v28 = vperm.slane %v3722_v12, 0  ;;  %v3737_v21 = vrot.slane %v1089_v10, 2  ;;  %v902_v15 = vsel %vm4903_vm0, %v3469_v35, %v3471_v34  ;;  %v963_v19 = vsel %vm849_vm4, %v3523_v42, %v3534_v11 }
  0xa3   : > { %2410 = vmatpush.msra.mxu0 %v1667_v36  ;;  %v1731_v54 = vmul.f32 %v1219_v30, %v3335_v8  ;;  %v903_v53 = vsel %vm4899_vm5, %v901_v20, %v902_v15  ;;  %v964_v14 = vsel %vm4903_vm0, %v3536_v13, %v3538_v29  ;;  %vm851_vm7 = vcmask 1041408  }
  0xa4   : > { %4988 = vst [vmem:[#allocation32_spill] sm:$0xff] %v3737_v21  ;;  %v1787_v10 = vmul.f32 %v1275_v28, %v3335_v8  ;;  %v1343_v43 = vperm.slane %v3737_v21, 0  ;;  %v3752_v12 = vrot.slane %v903_v53, 2  ;;  %v965_v37 = vsel %vm4899_vm5, %v963_v19, %v964_v14 }
  0xa5   : > { %2430 = vmatpush.msra.mxu1 %v1731_v54  ;;  %v3755_v52 = vrot.slane %v965_v37, 2  ;;  %v1018_v36 = vsel %vm847_vm13, %v3286_v56, %v3320_v51  ;;  %v1019_v30 = vsel %vm849_vm4, %v3322_v55, %v3324_v9  ;;  %v1083_v20 = vsel %vm853_vm10, %v3389_v38, %v3397_v0 }
  0xa6   : > { %4989 = vst [vmem:[#allocation33_spill] sm:$0xff] %v3752_v12  ;;  %2452 = vmatpush.msra.mxu2 %v1787_v10  ;;  %v1855_v28 = vmul.f32 %v1343_v43, %v3335_v8  ;;  %v1151_v15 = vperm.slane %v3752_v12, 0  ;;  %v3769_v37 = vsel %vm851_vm7, %v1018_v36, %v1019_v30  ;;  %v1084_v56 = vsel %vm4901_vm2, %v3399_v47, %v3404_v18 }
  0xa7   : > { %4990 = vst [vmem:[#allocation34_spill] sm:$0xff] %v3755_v52  ;;  %v1215_v51 = vperm.slane %v3755_v52, 0  ;;  %v1271_v55 = vperm.slane %v3769_v37, 0  ;;  %v1085_v9 = vsel %vm4898_vm6, %v1083_v20, %v1084_v56  ;;  %v897_v19 = vsel %vm853_vm10, %v3456_v16, %v3462_v22 }
  0xa8   : > { %4991 = vst [vmem:[#allocation35_spill] sm:$0xff] %v3769_v37  ;;  %2471 = vmatpush.msra.mxu3 %v1855_v28  ;;  %v1663_v54 = vmul.f32 %v1151_v15, %v3335_v8  ;;  %v3781_v53 = vrot.slane %v1085_v9, 1  ;;  %v898_v14 = vsel %vm4901_vm2, %v3469_v35, %v3471_v34  ;;  %v959_v10 = vsel %vm853_vm10, %v3523_v42, %v3534_v11 }
  0xa9   : > { %v1727_v43 = vmul.f32 %v1215_v51, %v3335_v8  ;;  %v1783_v36 = vmul.f32 %v1271_v55, %v3335_v8  ;;  %v899_v30 = vsel %vm4898_vm6, %v897_v19, %v898_v14  ;;  %v960_v20 = vsel %vm4901_vm2, %v3536_v13, %v3538_v29 }
  0xaa   : > { %4992 = vst [vmem:[#allocation36_spill] sm:$0xff] %v3781_v53  ;;  %2411 = vmatpush.msra.mxu0 %v1663_v54  ;;  %v1339_v28 = vperm.slane %v3781_v53, 0  ;;  %v3796_v15 = vrot.slane %v899_v30, 1  ;;  %v961_v56 = vsel %vm4898_vm6, %v959_v10, %v960_v20  ;;  %v246_v9 = vadd.s32 32, %v3102_v17 }
  0xab   : > { %2431 = vmatpush.msra.mxu1 %v1727_v43  ;;  %2453 = vmatpush.msra.mxu2 %v1783_v36  ;;  %v3800_v51 = vrot.slane %v961_v56, 1  ;;  %v1080_v55 = vsel %vm847_vm13, %v3389_v38, %v3397_v0  ;;  %v1081_v19 = vsel %vm849_vm4, %v3399_v47, %v3404_v18  ;;  %v894_v54 = vsel %vm847_vm13, %v3456_v16, %v3462_v22 }
  0xac   : > { %4993 = vst [vmem:[#allocation37_spill] sm:$0xff] %v3796_v15  ;;  %v1851_v14 = vmul.f32 %v1339_v28, %v3335_v8  ;;  %v1147_v10 = vperm.slane %v3796_v15, 0  ;;  %vm315_vm6 = vcmp.eq.s32.totalorder %v246_v9, %v3152_v60  ;;  %vm316_vm5 = vcmp.eq.s32.totalorder %v246_v9, %v3154_v61 }
  0xad   : > { %4994 = vst [vmem:[#allocation38_spill] sm:$0xff] %v3800_v51  ;;  %v1211_v43 = vperm.slane %v3800_v51, 0  ;;  %vm317_vm3 = vcmp.eq.s32.totalorder %v246_v9, %v3156_v62  ;;  %vm318_vm2 = vcmp.eq.s32.totalorder %v246_v9, %v3158_v63  ;;  %v361_v38 = vsel %vm315_vm6, %v3163_v1, 0.0 }
  0xae   : > { %2472 = vmatpush.msra.mxu3 %v1851_v14  ;;  %v1659_v0 = vmul.f32 %v1147_v10, %v3335_v8  ;;  %v362_v47 = vsel %vm316_vm5, %v3165_v2, 0.0  ;;  %v363_v18 = vsel %vm317_vm3, %v3167_v3, 0.0  ;;  %v364_v16 = vsel %vm318_vm2, %v3175_v4, 0.0 }
  0xaf   : > { %v1723_v22 = vmul.f32 %v1211_v43, %v3335_v8  ;;  %vm401_vm1 = vcmp.eq.s32.totalorder %v246_v9, %v3182_v23  ;;  %vm402_vm0 = vcmp.eq.s32.totalorder %v246_v9, %v3184_v24  ;;  %vm403_vm9 = vcmp.eq.s32.totalorder %v246_v9, %v3186_v25 }
  0xb0   : > { %2412 = vmatpush.msra.mxu0 %v1659_v0  ;;  %vm404_vm6 = vcmp.eq.s32.totalorder %v246_v9, %v3188_v26  ;;  %v447_v36 = vsel %vm401_vm1, %v3190_v27, 0.0  ;;  %v448_v30 = vsel %vm402_vm0, %v3192_v31, 0.0  ;;  %v449_v20 = vsel %vm403_vm9, %v3194_v32, 0.0 }
  0xb1   : > { %2432 = vmatpush.msra.mxu1 %v1723_v22  ;;  %v450_v28 = vsel %vm404_vm6, %v3196_v33, 0.0  ;;  %v479_v56 = vadd.f32 %v447_v36, %v361_v38  ;;  %v480_v14 = vadd.f32 %v448_v30, %v362_v47  ;;  %v481_v10 = vadd.f32 %v449_v20, %v363_v18 }
  0xb2   : > { %v482_v43 = vadd.f32 %v450_v28, %v364_v16  ;;  %vm519_vm2 = vcmp.eq.s32.totalorder %v246_v9, %v3222_v57  ;;  %vm520_vm3 = vcmp.eq.s32.totalorder %v246_v9, %v3224_v58  ;;  %vm521_vm5 = vcmp.eq.s32.totalorder %v246_v9, %v3226_v59  ;;  %v4995_v28 = vld [vmem:[#allocation6_spill] sm:$0xff] }
  0xb3   : > { %vm522_vm8 = vcmp.eq.s32.totalorder %v246_v9, %v3228_v5  ;;  %v565_v0 = vsel %vm519_vm2, %v3230_v46, 0.0  ;;  %v566_v51 = vsel %vm520_vm3, %v3232_v6, 0.0  ;;  %v567_v22 = vsel %vm521_vm5, %v3234_v48, 0.0 }
  0xb4   : > { %v568_v15 = vsel %vm522_vm8, %v3236_v7, 0.0  ;;  %v597_v38 = vadd.f32 %v565_v0, %v479_v56  ;;  %v598_v47 = vadd.f32 %v566_v51, %v480_v14  ;;  %v599_v18 = vadd.f32 %v567_v22, %v481_v10 }
  0xb5   : > { %v600_v16 = vadd.f32 %v568_v15, %v482_v43  ;;  %vm637_vm9 = vcmp.eq.s32.totalorder %v246_v9, %v3258_v44  ;;  %vm638_vm0 = vcmp.eq.s32.totalorder %v246_v9, %v3260_v39  ;;  %vm639_vm1 = vcmp.eq.s32.totalorder %v246_v9, %v3262_v40 }
  0xb6   : > { %vm640_vm6 = vcmp.eq.s32.totalorder %v246_v9, %v3264_v41  ;;  %v683_v36 = vsel %vm637_vm9, %v3266_v49, 0.0  ;;  %v684_v30 = vsel %vm638_vm0, %v3268_v45, 0.0  ;;  %v685_v20 = vsel %vm639_vm1, %v3270_v50, 0.0 }
  0xb7   : > { %v686_v53 = vsel %vm640_vm6, %v4995_v28, 0.0  ;;  %v3848_v56 = vadd.f32 %v683_v36, %v597_v38  ;;  %v716_v51 = vadd.f32 %v684_v30, %v598_v47  ;;  %v717_v15 = vadd.f32 %v685_v20, %v599_v18 }
  0xb8   : > { %v718_v14 = vadd.f32 %v686_v53, %v600_v16  ;;  %v3851_v10 = vsel %vm851_vm7, %v1080_v55, %v1081_v19  ;;  %v895_v9 = vsel %vm849_vm4, %v3469_v35, %v3471_v34  ;;  %v956_v43 = vsel %vm847_vm13, %v3523_v42, %v3534_v11 }
  0xb9   : > { %4996 = vst [vmem:[#allocation6_spill] sm:$0xff] %v3851_v10  ;;  %v3859_v0 = vrot.slane %v716_v51, 7  ;;  %v3861_v22 = vrot.slane %v717_v15, 6  ;;  %v1335_v38 = vperm.slane %v3851_v10, 0  ;;  %v3865_v47 = vsel %vm851_vm7, %v894_v54, %v895_v9 }
  0xba   : > { %4997 = vst [vmem:[#allocation39_spill] sm:$0xff] %v3865_v47  ;;  %v3867_v53 = vrot.slane %v718_v14, 5  ;;  %v1143_v55 = vperm.slane %v3865_v47, 0  ;;  %v957_v35 = vsel %vm849_vm4, %v3536_v13, %v3538_v29  ;;  %v3874_v34 = vadd.s32 48, %v3102_v17 }
  0xbb   : > { %v1014_v42 = vsel %vm879_vm11, %v3859_v0, %v3848_v56  ;;  %v1847_v11 = vmul.f32 %v1335_v38, %v3335_v8  ;;  %v3881_v19 = vsel %vm851_vm7, %v956_v43, %v957_v35  ;;  %v1010_v54 = vsel %vm873_vm14, %v3848_v56, %v3859_v0 }
  0xbc   : > { %4998 = vst [vmem:[#allocation40_spill] sm:$0xff] %v3881_v19  ;;  %v1015_v13 = vsel %vm853_vm10, %v3861_v22, %v3867_v53  ;;  %v1655_v29 = vmul.f32 %v1143_v55, %v3335_v8  ;;  %v1207_v18 = vperm.slane %v3881_v19, 0  ;;  %v1011_v16 = vsel %vm847_vm13, %v3861_v22, %v3867_v53 }
  0xbd   : > { %v1016_v36 = vsel %vm891_vm12, %v1015_v13, %v1014_v42  ;;  %2473 = vmatpush.msra.mxu3 %v1847_v11  ;;  %v1012_v30 = vsel %vm886_vm15, %v1011_v16, %v1010_v54  ;;  %vm323_vm8 = vcmp.eq.s32.totalorder %v3874_v34, %v3152_v60  ;;  %vm324_vm2 = vcmp.eq.s32.totalorder %v3874_v34, %v3154_v61 }
  0xbe   : > { %v3900_v20 = vrot.slane %v1016_v36, 7  ;;  %2413 = vmatpush.msra.mxu0 %v1655_v29  ;;  %v1719_v51 = vmul.f32 %v1207_v18, %v3335_v8  ;;  %v3903_v15 = vrot.slane %v1012_v30, 6  ;;  %vm325_vm3 = vcmp.eq.s32.totalorder %v3874_v34, %v3156_v62 }
  0xbf   : > { %vm326_vm5 = vcmp.eq.s32.totalorder %v3874_v34, %v3158_v63  ;;  %v369_v14 = vsel %vm323_vm8, %v3163_v1, 0.0  ;;  %v370_v9 = vsel %vm324_vm2, %v3165_v2, 0.0  ;;  %v371_v43 = vsel %vm325_vm3, %v3167_v3, 0.0 }
  0xc0   : > { %4999 = vst [vmem:[#allocation41_spill] sm:$0xff] %v3900_v20  ;;  %v1267_v38 = vperm.slane %v3900_v20, 0  ;;  %2433 = vmatpush.msra.mxu1 %v1719_v51  ;;  %v1263_v55 = vperm.slane %v3903_v15, 0  ;;  %v372_v35 = vsel %vm326_vm5, %v3175_v4, 0.0  ;;  %vm409_vm9 = vcmp.eq.s32.totalorder %v3874_v34, %v3182_v23 }
  0xc1   : > { %5000 = vst [vmem:[#allocation42_spill] sm:$0xff] %v3903_v15  ;;  %vm410_vm0 = vcmp.eq.s32.totalorder %v3874_v34, %v3184_v24  ;;  %vm411_vm1 = vcmp.eq.s32.totalorder %v3874_v34, %v3186_v25  ;;  %vm412_vm6 = vcmp.eq.s32.totalorder %v3874_v34, %v3188_v26  ;;  %v455_v42 = vsel %vm409_vm9, %v3190_v27, 0.0 }
  0xc2   : > { %v1779_v11 = vmul.f32 %v1267_v38, %v3335_v8  ;;  %v1775_v54 = vmul.f32 %v1263_v55, %v3335_v8  ;;  %v456_v13 = vsel %vm410_vm0, %v3192_v31, 0.0  ;;  %v457_v29 = vsel %vm411_vm1, %v3194_v32, 0.0 }
  0xc3   : > { %v458_v18 = vsel %vm412_vm6, %v3196_v33, 0.0  ;;  %v487_v16 = vadd.f32 %v455_v42, %v369_v14  ;;  %v488_v36 = vadd.f32 %v456_v13, %v370_v9  ;;  %v489_v30 = vadd.f32 %v457_v29, %v371_v43 }
  0xc4   : > { %2454 = vmatpush.msra.mxu2 %v1779_v11  ;;  %v490_v51 = vadd.f32 %v458_v18, %v372_v35  ;;  %vm527_vm8 = vcmp.eq.s32.totalorder %v3874_v34, %v3222_v57  ;;  %vm528_vm2 = vcmp.eq.s32.totalorder %v3874_v34, %v3224_v58  ;;  %vm529_vm3 = vcmp.eq.s32.totalorder %v3874_v34, %v3226_v59 }
  0xc5   : > { %vm530_vm5 = vcmp.eq.s32.totalorder %v3874_v34, %v3228_v5  ;;  %v573_v38 = vsel %vm527_vm8, %v3230_v46, 0.0  ;;  %v574_v14 = vsel %vm528_vm2, %v3232_v6, 0.0  ;;  %v575_v9 = vsel %vm529_vm3, %v3234_v48, 0.0 }
  0xc6   : > { %2455 = vmatpush.msra.mxu2 %v1775_v54  ;;  %v576_v43 = vsel %vm530_vm5, %v3236_v7, 0.0  ;;  %v605_v55 = vadd.f32 %v573_v38, %v487_v16  ;;  %v606_v35 = vadd.f32 %v574_v14, %v488_v36  ;;  %v607_v42 = vadd.f32 %v575_v9, %v489_v30 }
  0xc7   : > { %v608_v11 = vadd.f32 %v576_v43, %v490_v51  ;;  %vm645_vm9 = vcmp.eq.s32.totalorder %v3874_v34, %v3258_v44  ;;  %vm646_vm0 = vcmp.eq.s32.totalorder %v3874_v34, %v3260_v39  ;;  %vm647_vm1 = vcmp.eq.s32.totalorder %v3874_v34, %v3262_v40 }
  0xc8   : > { %vm648_vm6 = vcmp.eq.s32.totalorder %v3874_v34, %v3264_v41  ;;  %v691_v54 = vsel %vm645_vm9, %v3266_v49, 0.0  ;;  %v692_v13 = vsel %vm646_vm0, %v3268_v45, 0.0  ;;  %v693_v29 = vsel %vm647_vm1, %v3270_v50, 0.0 }
  0xc9   : > { %v694_v18 = vsel %vm648_vm6, %v4995_v28, 0.0  ;;  %v3953_v16 = vadd.f32 %v691_v54, %v605_v55  ;;  %v724_v36 = vadd.f32 %v692_v13, %v606_v35  ;;  %v725_v30 = vadd.f32 %v693_v29, %v607_v42 }
  0xca   : > { %v726_v51 = vadd.f32 %v694_v18, %v608_v11  ;;  %vm299_vm8 = vcmp.eq.s32.totalorder %v3102_v17, %v3152_v60  ;;  %vm300_vm2 = vcmp.eq.s32.totalorder %v3102_v17, %v3154_v61  ;;  %vm301_vm3 = vcmp.eq.s32.totalorder %v3102_v17, %v3156_v62 }
  0xcb   : > { %v3961_v34 = vrot.slane %v724_v36, 7  ;;  %v3963_v38 = vrot.slane %v725_v30, 6  ;;  %vm302_vm5 = vcmp.eq.s32.totalorder %v3102_v17, %v3158_v63  ;;  %v345_v14 = vsel %vm299_vm8, %v3163_v1, 0.0 }
  0xcc   : > { %v3968_v9 = vrot.slane %v726_v51, 5  ;;  %v346_v43 = vsel %vm300_vm2, %v3165_v2, 0.0  ;;  %v347_v55 = vsel %vm301_vm3, %v3167_v3, 0.0  ;;  %v348_v35 = vsel %vm302_vm5, %v3175_v4, 0.0 }
  0xcd   : > { %v1076_v42 = vsel %vm879_vm11, %v3961_v34, %v3953_v16  ;;  %vm385_vm9 = vcmp.eq.s32.totalorder %v3102_v17, %v3182_v23  ;;  %vm386_vm0 = vcmp.eq.s32.totalorder %v3102_v17, %v3184_v24  ;;  %vm387_vm1 = vcmp.eq.s32.totalorder %v3102_v17, %v3186_v25 }
  0xce   : > { %v1077_v11 = vsel %vm853_vm10, %v3963_v38, %v3968_v9  ;;  %vm388_vm6 = vcmp.eq.s32.totalorder %v3102_v17, %v3188_v26  ;;  %v431_v54 = vsel %vm385_vm9, %v3190_v27, 0.0  ;;  %v432_v13 = vsel %vm386_vm0, %v3192_v31, 0.0 }
  0xcf   : > { %v1078_v29 = vsel %vm891_vm12, %v1077_v11, %v1076_v42  ;;  %v433_v18 = vsel %vm387_vm1, %v3194_v32, 0.0  ;;  %v434_v36 = vsel %vm388_vm6, %v3196_v33, 0.0  ;;  %v463_v30 = vadd.f32 %v431_v54, %v345_v14 }
  0xd0   : > { %v3992_v51 = vrot.slane %v1078_v29, 7  ;;  %v464_v15 = vadd.f32 %v432_v13, %v346_v43  ;;  %v465_v19 = vadd.f32 %v433_v18, %v347_v55  ;;  %v466_v47 = vadd.f32 %v434_v36, %v348_v35 }
  0xd1   : > { %vm503_vm8 = vcmp.eq.s32.totalorder %v3102_v17, %v3222_v57  ;;  %vm504_vm2 = vcmp.eq.s32.totalorder %v3102_v17, %v3224_v58  ;;  %vm505_vm3 = vcmp.eq.s32.totalorder %v3102_v17, %v3226_v59  ;;  %vm506_vm5 = vcmp.eq.s32.totalorder %v3102_v17, %v3228_v5 }
  0xd2   : > { %5001 = vst [vmem:[#allocation43_spill] sm:$0xff] %v3992_v51  ;;  %v1331_v42 = vperm.slane %v3992_v51, 0  ;;  %v549_v14 = vsel %vm503_vm8, %v3230_v46, 0.0  ;;  %v550_v43 = vsel %vm504_vm2, %v3232_v6, 0.0  ;;  %v551_v55 = vsel %vm505_vm3, %v3234_v48, 0.0 }
  0xd3   : > { %v552_v35 = vsel %vm506_vm5, %v3236_v7, 0.0  ;;  %v581_v11 = vadd.f32 %v549_v14, %v463_v30  ;;  %v582_v54 = vadd.f32 %v550_v43, %v464_v15  ;;  %v583_v13 = vadd.f32 %v551_v55, %v465_v19 }
  0xd4   : > { %v1843_v29 = vmul.f32 %v1331_v42, %v3335_v8  ;;  %v584_v18 = vadd.f32 %v552_v35, %v466_v47  ;;  %vm621_vm9 = vcmp.eq.s32.totalorder %v3102_v17, %v3258_v44  ;;  %vm622_vm0 = vcmp.eq.s32.totalorder %v3102_v17, %v3260_v39 }
  0xd5   : > { %vm623_vm1 = vcmp.eq.s32.totalorder %v3102_v17, %v3262_v40  ;;  %vm624_vm6 = vcmp.eq.s32.totalorder %v3102_v17, %v3264_v41  ;;  %v667_v36 = vsel %vm621_vm9, %v3266_v49, 0.0  ;;  %v668_v15 = vsel %vm622_vm0, %v3268_v45, 0.0 }
  0xd6   : > { %2474 = vmatpush.msra.mxu3 %v1843_v29  ;;  %v669_v19 = vsel %vm623_vm1, %v3270_v50, 0.0  ;;  %v670_v47 = vsel %vm624_vm6, %v4995_v28, 0.0  ;;  %v4020_v30 = vadd.f32 %v667_v36, %v581_v11  ;;  %v700_v42 = vadd.f32 %v668_v15, %v582_v54 }
  0xd7   : > { %v701_v14 = vadd.f32 %v669_v19, %v583_v13  ;;  %v702_v43 = vadd.f32 %v670_v47, %v584_v18  ;;  %v244_v55 = vadd.s32 16, %v3102_v17  ;;  %vm5002_vm8 = vcmask 1045509  }
  0xd8   : > { %v1006_v35 = vsel %vm5002_vm8, %v3848_v56, %v3859_v0  ;;  %v4026_v51 = vrot.slane %v700_v42, 7  ;;  %v1007_v29 = vsel %vm879_vm11, %v3867_v53, %v3861_v22  ;;  %v1072_v11 = vsel %vm873_vm14, %v3953_v16, %v3961_v34 }
  0xd9   : > { %v1073_v54 = vsel %vm847_vm13, %v3963_v38, %v3968_v9  ;;  %v4037_v13 = vrot.slane %v701_v14, 6  ;;  %v4039_v17 = vrot.slane %v702_v43, 5  ;;  %vm307_vm2 = vcmp.eq.s32.totalorder %v244_v55, %v3152_v60 }
  0xda   : > { %vm308_vm3 = vcmp.eq.s32.totalorder %v244_v55, %v3154_v61  ;;  %v889_v18 = vsel %vm879_vm11, %v4026_v51, %v4020_v30  ;;  %vm309_vm5 = vcmp.eq.s32.totalorder %v244_v55, %v3156_v62  ;;  %vm310_vm9 = vcmp.eq.s32.totalorder %v244_v55, %v3158_v63 }
  0xdb   : > { %v353_v36 = vsel %vm307_vm2, %v3163_v1, 0.0  ;;  %v890_v15 = vsel %vm853_vm10, %v4037_v13, %v4039_v17  ;;  %v354_v19 = vsel %vm308_vm3, %v3165_v2, 0.0  ;;  %v355_v60 = vsel %vm309_vm5, %v3167_v3, 0.0 }
  0xdc   : > { %v356_v61 = vsel %vm310_vm9, %v3175_v4, 0.0  ;;  %v892_v47 = vsel %vm891_vm12, %v890_v15, %v889_v18  ;;  %vm393_vm0 = vcmp.eq.s32.totalorder %v244_v55, %v3182_v23  ;;  %vm394_vm1 = vcmp.eq.s32.totalorder %v244_v55, %v3184_v24 }
  0xdd   : > { %vm395_vm6 = vcmp.eq.s32.totalorder %v244_v55, %v3186_v25  ;;  %v4059_v62 = vrot.slane %v892_v47, 7  ;;  %vm396_vm8 = vcmp.eq.s32.totalorder %v244_v55, %v3188_v26  ;;  %v439_v63 = vsel %vm393_vm0, %v3190_v27, 0.0 }
  0xde   : > { %v440_v1 = vsel %vm394_vm1, %v3192_v31, 0.0  ;;  %v441_v2 = vsel %vm395_vm6, %v3194_v32, 0.0  ;;  %v442_v3 = vsel %vm396_vm8, %v3196_v33, 0.0  ;;  %v471_v4 = vadd.f32 %v439_v63, %v353_v36 }
  0xdf   : > { %v472_v42 = vadd.f32 %v440_v1, %v354_v19  ;;  %v1139_v23 = vperm.slane %v4059_v62, 0  ;;  %v473_v14 = vadd.f32 %v441_v2, %v355_v60  ;;  %v474_v24 = vadd.f32 %v442_v3, %v356_v61 }
  0xe0   : > { %vm511_vm2 = vcmp.eq.s32.totalorder %v244_v55, %v3222_v57  ;;  %vm512_vm3 = vcmp.eq.s32.totalorder %v244_v55, %v3224_v58  ;;  %vm513_vm5 = vcmp.eq.s32.totalorder %v244_v55, %v3226_v59  ;;  %vm514_vm9 = vcmp.eq.s32.totalorder %v244_v55, %v3228_v5 }
  0xe1   : > { %v557_v25 = vsel %vm511_vm2, %v3230_v46, 0.0  ;;  %v1651_v26 = vmul.f32 %v1139_v23, %v3335_v8  ;;  %v558_v27 = vsel %vm512_vm3, %v3232_v6, 0.0  ;;  %v559_v31 = vsel %vm513_vm5, %v3234_v48, 0.0 }
  0xe2   : > { %v560_v32 = vsel %vm514_vm9, %v3236_v7, 0.0  ;;  %v589_v33 = vadd.f32 %v557_v25, %v471_v4  ;;  %v590_v43 = vadd.f32 %v558_v27, %v472_v42  ;;  %v591_v18 = vadd.f32 %v559_v31, %v473_v14 }
  0xe3   : > { %v592_v57 = vadd.f32 %v560_v32, %v474_v24  ;;  %2414 = vmatpush.msra.mxu0 %v1651_v26  ;;  %vm629_vm0 = vcmp.eq.s32.totalorder %v244_v55, %v3258_v44  ;;  %vm630_vm1 = vcmp.eq.s32.totalorder %v244_v55, %v3260_v39  ;;  %vm631_vm6 = vcmp.eq.s32.totalorder %v244_v55, %v3262_v40 }
  0xe4   : > { %vm632_vm8 = vcmp.eq.s32.totalorder %v244_v55, %v3264_v41  ;;  %v675_v58 = vsel %vm629_vm0, %v3266_v49, 0.0  ;;  %v676_v59 = vsel %vm630_vm1, %v3268_v45, 0.0  ;;  %v677_v5 = vsel %vm631_vm6, %v3270_v50, 0.0 }
  0xe5   : > { %v678_v46 = vsel %vm632_vm8, %v4995_v28, 0.0  ;;  %v4084_v6 = vadd.f32 %v675_v58, %v589_v33  ;;  %v708_v48 = vadd.f32 %v676_v59, %v590_v43  ;;  %v709_v7 = vadd.f32 %v677_v5, %v591_v18 }
  0xe6   : > { %v710_v36 = vadd.f32 %v678_v46, %v592_v57  ;;  %vm5003_vm2 = vcmask 1046533   ;;  %v1074_v39 = vsel %vm886_vm15, %v1073_v54, %v1072_v11  ;;  %v884_v40 = vsel %vm873_vm14, %v4020_v30, %v4026_v51 }
  0xe7   : > { %v1008_v44 = vsel %vm5003_vm2, %v1006_v35, %v1007_v29  ;;  %v885_v41 = vsel %vm847_vm13, %v4037_v13, %v4039_v17  ;;  %v4094_v49 = vrot.slane %v708_v48, 7  ;;  %v4096_v45 = vrot.slane %v709_v7, 6  ;;  %vm5009_vm0 = vmmov %vm5003_vm2 }
  0xe8   : > { %v4098_v50 = vrot.slane %v710_v36, 5  ;;  %v4100_v28 = vrot.slane %v1008_v44, 5  ;;  %v4102_v55 = vrot.slane %v1074_v39, 6  ;;  %v887_v35 = vsel %vm886_vm15, %v885_v41, %v884_v40  ;;  %vm5011_vm6 = vmmov %vm5009_vm0 }
  0xe9   : > { %vm5004_vm3 = vcmask 1044484   ;;  %v1003_v11 = vsel %vm873_vm14, %v3861_v22, %v3867_v53  ;;  %v952_v54 = vsel %vm879_vm11, %v4094_v49, %v4084_v6  ;;  %v4118_v60 = vrot.slane %v887_v35, 6 }
  0xea   : > { %v1002_v29 = vsel %vm5004_vm3, %v3848_v56, %v3859_v0  ;;  %v953_v15 = vsel %vm853_vm10, %v4096_v45, %v4098_v50  ;;  %v1259_v19 = vperm.slane %v4100_v28, 0  ;;  %v1327_v47 = vperm.slane %v4102_v55, 0 }
  0xeb   : > { %v954_v61 = vsel %vm891_vm12, %v953_v15, %v952_v54  ;;  %v948_v63 = vsel %vm873_vm14, %v4084_v6, %v4094_v49  ;;  %v949_v1 = vsel %vm847_vm13, %v4096_v45, %v4098_v50  ;;  %v1135_v4 = vperm.slane %v4118_v60, 0 }
  0xec   : > { %v4128_v2 = vrot.slane %v954_v61, 7  ;;  %v1771_v3 = vmul.f32 %v1259_v19, %v3335_v8  ;;  %v950_v42 = vsel %vm886_vm15, %v949_v1, %v948_v63  ;;  %v1839_v23 = vmul.f32 %v1327_v47, %v3335_v8  ;;  %vm5007_vm15 = vmmov %vm5003_vm2  ;;  %v5016_v63 = vld [vmem:[#allocation10_spill] sm:$0xff] }
  0xed   : > { %v4134_v14 = vrot.slane %v950_v42, 6  ;;  %vm5005_vm12 = vcmask 1045508   ;;  %vm5006_vm5 = vcmask 1045509   ;;  %v1647_v27 = vmul.f32 %v1135_v4, %v3335_v8 }
  0xee   : > { %v1004_v24 = vsel %vm5005_vm12, %v1002_v29, %v1003_v11  ;;  %v1068_v25 = vsel %vm5006_vm5, %v3953_v16, %v3961_v34  ;;  %v1203_v26 = vperm.slane %v4128_v2, 0  ;;  %2456 = vmatpush.msra.mxu2 %v1771_v3  ;;  %v1069_v32 = vsel %vm879_vm11, %v3968_v9, %v3963_v38  ;;  %2475 = vmatpush.msra.mxu3 %v1839_v23  ;;  %vm5008_vm9 = vmmov %vm5006_vm5 }
  0xef   : > { %v4142_v31 = vrot.slane %v1004_v24, 4  ;;  %v1199_v33 = vperm.slane %v4134_v14, 0  ;;  %v1070_v43 = vsel %vm5007_vm15, %v1068_v25, %v1069_v32  ;;  %v878_v18 = vsel %vm5008_vm9, %v4020_v30, %v4026_v51  ;;  %2415 = vmatpush.msra.mxu0 %v1647_v27  ;;  %vm5010_vm1 = vmmov %vm5006_vm5 }
  0xf0   : > { %v880_v57 = vsel %vm879_vm11, %v4039_v17, %v4037_v13  ;;  %v1715_v58 = vmul.f32 %v1203_v26, %v3335_v8  ;;  %v4157_v5 = vrot.slane %v1070_v43, 5  ;;  %v944_v36 = vsel %vm5010_vm1, %v4084_v6, %v4094_v49  ;;  %vm5013_vm2 = vmmov %vm5010_vm1 }
  0xf1   : > { %v1255_v59 = vperm.slane %v4142_v31, 0  ;;  %v882_v46 = vsel %vm5009_vm0, %v878_v18, %v880_v57  ;;  %v1711_v48 = vmul.f32 %v1199_v33, %v3335_v8  ;;  %v945_v44 = vsel %vm879_vm11, %v4098_v50, %v4096_v45  ;;  %vm5014_vm11 = vmmov %vm5004_vm3 }
  0xf2   : > { %v4161_v7 = vrot.slane %v882_v46, 5  ;;  %2434 = vmatpush.msra.mxu1 %v1715_v58  ;;  %v1323_v40 = vperm.slane %v4157_v5, 0  ;;  %v946_v41 = vsel %vm5011_vm6, %v944_v36, %v945_v44  ;;  %vm5012_vm8 = vcmask 1043459   ;;  %vm5017_vm5 = vmmov %vm5014_vm11 }
  0xf3   : > { %v1767_v39 = vmul.f32 %v1255_v59, %v3335_v8  ;;  %v998_v35 = vsel %vm5012_vm8, %v3848_v56, %v3859_v0  ;;  %v4176_v11 = vrot.slane %v946_v41, 5  ;;  %v999_v54 = vsel %vm5013_vm2, %v3861_v22, %v3867_v53  ;;  %vm5018_vm15 = vmmov %vm5017_vm5 }
  0xf4   : > { %v1131_v29 = vperm.slane %v4161_v7, 0  ;;  %v1064_v15 = vsel %vm5014_vm11, %v3953_v16, %v3961_v34  ;;  %2435 = vmatpush.msra.mxu1 %v1711_v48  ;;  %v1835_v19 = vmul.f32 %v1323_v40, %v3335_v8  ;;  %vm5015_vm3 = vcmask 1044483   ;;  %vm5019_vm9 = vmmov %vm5005_vm12 }
  0xf5   : > { %2457 = vmatpush.msra.mxu2 %v1767_v39  ;;  %v1000_v61 = vsel %vm5015_vm3, %v998_v35, %v999_v54  ;;  %v1065_v47 = vsel %vm873_vm14, %v3963_v38, %v3968_v9  ;;  %v1300_v1 = vperm.slane %v5016_v63, 1  ;;  %v1195_v4 = vperm.slane %v4176_v11, 0  ;;  %vm5020_vm0 = vmmov %vm5019_vm9 }
  0xf6   : > { %v1643_v3 = vmul.f32 %v1131_v29, %v3335_v8  ;;  %v4192_v42 = vrot.slane %v1000_v61, 3  ;;  %v1066_v23 = vsel %vm5005_vm12, %v1064_v15, %v1065_v47  ;;  %2476 = vmatpush.msra.mxu3 %v1835_v19  ;;  %v872_v25 = vsel %vm5017_vm5, %v4020_v30, %v4026_v51  ;;  %vm5021_vm1 = vmmov %vm5017_vm5 }
  0xf7   : > { %v4195_v24 = vrot.slane %v1066_v23, 4  ;;  %v874_v26 = vsel %vm873_vm14, %v4037_v13, %v4039_v17  ;;  %v940_v27 = vsel %vm5018_vm15, %v4084_v6, %v4094_v49  ;;  %v1707_v32 = vmul.f32 %v1195_v4, %v3335_v8 }
  0xf8   : > { %2416 = vmatpush.msra.mxu0 %v1643_v3  ;;  %v1251_v33 = vperm.slane %v4192_v42, 0  ;;  %v876_v43 = vsel %vm5019_vm9, %v872_v25, %v874_v26  ;;  %v941_v18 = vsel %vm873_vm14, %v4096_v45, %v4098_v50  ;;  %v994_v46 = vsel %vm849_vm4, %v3848_v56, %v3859_v0  ;;  %vm5022_vm14 = vmmov %vm5012_vm8 }
  0xf9   : > { %v1319_v57 = vperm.slane %v4195_v24, 0  ;;  %v4213_v58 = vrot.slane %v876_v43, 4  ;;  %v942_v59 = vsel %vm5020_vm0, %v940_v27, %v941_v18  ;;  %2436 = vmatpush.msra.mxu1 %v1707_v32  ;;  %v995_v44 = vsel %vm5021_vm1, %v3861_v22, %v3867_v53  ;;  %vm5024_vm8 = vmmov %vm5013_vm2 }
  0xfa   : > { %v1763_v48 = vmul.f32 %v1251_v33, %v3335_v8  ;;  %v4220_v36 = vrot.slane %v942_v59, 4  ;;  %v1060_v39 = vsel %vm5022_vm14, %v3953_v16, %v3961_v34  ;;  %vm5023_vm6 = vcmask 1043458   ;;  %vm5025_vm2 = vmmov %vm5015_vm3 }
  0xfb   : > { %v1831_v40 = vmul.f32 %v1319_v57, %v3335_v8  ;;  %v1127_v41 = vperm.slane %v4213_v58, 0  ;;  %v996_v35 = vsel %vm5023_vm6, %v994_v46, %v995_v44  ;;  %v1061_v29 = vsel %vm5024_vm8, %v3963_v38, %v3968_v9  ;;  %vm5026_vm11 = vmmov %vm5022_vm14 }
  0xfc   : > { %2458 = vmatpush.msra.mxu2 %v1763_v48  ;;  %v1191_v54 = vperm.slane %v4220_v36, 0  ;;  %v4235_v15 = vrot.slane %v996_v35, 2  ;;  %v1062_v19 = vsel %vm5025_vm2, %v1060_v39, %v1061_v29  ;;  %v866_v61 = vsel %vm5026_vm11, %v4020_v30, %v4026_v51  ;;  %vm5027_vm3 = vmmov %vm5024_vm8 }
  0xfd   : > { %2477 = vmatpush.msra.mxu3 %v1831_v40  ;;  %v1639_v47 = vmul.f32 %v1127_v41, %v3335_v8  ;;  %v4242_v3 = vrot.slane %v1062_v19, 3  ;;  %v868_v4 = vsel %vm5027_vm3, %v4037_v13, %v4039_v17  ;;  %vm5028_vm12 = vmmov %vm5026_vm11  ;;  %v990_v57 = vsel %vm853_vm10, %v3848_v56, %v3859_v0 }
  0xfe   : > { %v936_v23 = vsel %vm5028_vm12, %v4084_v6, %v4094_v49  ;;  %v1703_v25 = vmul.f32 %v1191_v54, %v3335_v8  ;;  %v1247_v26 = vperm.slane %v4235_v15, 0  ;;  %vm5029_vm5 = vmmov %vm5025_vm2  ;;  %v1056_v44 = vsel %vm849_vm4, %v3953_v16, %v3961_v34 }
  0xff   : > { %v870_v27 = vsel %vm5029_vm5, %v866_v61, %v868_v4  ;;  %vm5030_vm15 = vmmov %vm5027_vm3  ;;  %2417 = vmatpush.msra.mxu0 %v1639_v47  ;;  %v1315_v33 = vperm.slane %v4242_v3, 0  ;;  %vm5033_vm1 = vcmask 1042433   ;;  %vm5034_vm14 = vcmask 1044484   ;;  %v2136_v47 = vld [vmem:[%s4268_s30 + $0x8] sm:$0xff] }
 0x100   : > { %v937_v32 = vsel %vm5030_vm15, %v4096_v45, %v4098_v50  ;;  %v4257_v43 = vrot.slane %v870_v27, 3  ;;  %vm5031_vm9 = vmmov %vm5025_vm2  ;;  %2437 = vmatpush.msra.mxu1 %v1703_v25  ;;  %v1759_v59 = vmul.f32 %v1247_v26, %v3335_v8  ;;  %v1057_v35 = vsel %vm5034_vm14, %v3963_v38, %v3968_v9  ;;  %2397 = vst [vmem:[#allocation1 + $0x10] ss:$2 sm:$0xff] %v2136_v47 }
 0x101   : > { %v938_v18 = vsel %vm5031_vm9, %v936_v23, %v937_v32  ;;  %vm5032_vm0 = vmmov %vm5026_vm11  ;;  %v1827_v39 = vmul.f32 %v1315_v33, %v3335_v8  ;;  %v1058_v19 = vsel %vm5023_vm6, %v1056_v44, %v1057_v35  ;;  %v860_v61 = vsel %vm849_vm4, %v4020_v30, %v4026_v51 }
 0x102   : > { %v4271_v46 = vrot.slane %v938_v18, 3  ;;  %v991_v48 = vsel %vm5032_vm0, %v3861_v22, %v3867_v53  ;;  %v1123_v40 = vperm.slane %v4257_v43, 0  ;;  %2459 = vmatpush.msra.mxu2 %v1759_v59  ;;  %v4294_v23 = vrot.slane %v1058_v19, 2  ;;  %vm5036_vm8 = vmmov %vm5034_vm14 }
 0x103   : > { %v992_v41 = vsel %vm5033_vm1, %v990_v57, %v991_v48  ;;  %2478 = vmatpush.msra.mxu3 %v1827_v39  ;;  %v862_v25 = vsel %vm5036_vm8, %v4037_v13, %v4039_v17  ;;  %v932_v26 = vsel %vm849_vm4, %v4084_v6, %v4094_v49  ;;  %vm5037_vm2 = vmmov %vm5023_vm6  ;;  %v987_v44 = vsel %vm847_vm13, %v3848_v56, %v3859_v0 }
 0x104   : > { %v1187_v29 = vperm.slane %v4271_v46, 0  ;;  %v4286_v54 = vrot.slane %v992_v41, 1  ;;  %v1635_v4 = vmul.f32 %v1123_v40, %v3335_v8  ;;  %v864_v33 = vsel %vm5037_vm2, %v860_v61, %v862_v25  ;;  %vm5038_vm11 = vmmov %vm5036_vm8 }
 0x105   : > { %v933_v18 = vsel %vm5038_vm11, %v4096_v45, %v4098_v50  ;;  %v1311_v57 = vperm.slane %v4294_v23, 0  ;;  %v4309_v59 = vrot.slane %v864_v33, 2  ;;  %vm5040_vm3 = vmmov %vm5037_vm2  ;;  %v988_v41 = vsel %vm849_vm4, %v3861_v22, %v3867_v53 }
 0x106   : > { %5035 = vst [vmem:[#allocation10_spill] sm:$0xff] %v4286_v54  ;;  %v1699_v27 = vmul.f32 %v1187_v29, %v3335_v8  ;;  %v1243_v32 = vperm.slane %v4286_v54, 0  ;;  %2418 = vmatpush.msra.mxu0 %v1635_v4  ;;  %v934_v48 = vsel %vm5040_vm3, %v932_v26, %v933_v18  ;;  %v1052_v35 = vsel %vm853_vm10, %v3953_v16, %v3961_v34  ;;  %v2135_v29 = vld [vmem:[%s4268_s30] sm:$0xff]  ;;  %vm5043_vm12 = vmmov %vm5032_vm0  ;;  %v5045_v4 = vld [vmem:[#allocation7_spill] sm:$0xff] }
 0x107   : > { %5039 = vst [vmem:[#allocation44_spill] sm:$0xff] %v4309_v59  ;;  %v4316_v40 = vrot.slane %v934_v48, 2  ;;  %v1823_v19 = vmul.f32 %v1311_v57, %v3335_v8  ;;  %v1119_v61 = vperm.slane %v4309_v59, 0  ;;  %v4328_v56 = vsel %vm851_vm7, %v987_v44, %v988_v41  ;;  %vm5044_vm5 = vmmov %vm5033_vm1 }
 0x108   : > { %2438 = vmatpush.msra.mxu1 %v1699_v27  ;;  %v1755_v39 = vmul.f32 %v1243_v32, %v3335_v8  ;;  %5042 = vst [vmem:[#allocation46_spill] sm:$0xff] %v4328_v56  ;;  %v1053_v0 = vsel %vm5043_vm12, %v3963_v38, %v3968_v9  ;;  %v1239_v53 = vperm.slane %v4328_v56, 0  ;;  %v1812_v25 = vmul.f32 %v1300_v1, %v5045_v4  ;;  %vm5047_vm15 = vmmov %vm5032_vm0 }
 0x109   : > { %5041 = vst [vmem:[#allocation45_spill] sm:$0xff] %v4316_v40  ;;  %v1183_v22 = vperm.slane %v4316_v40, 0  ;;  %v1054_v47 = vsel %vm5044_vm5, %v1052_v35, %v1053_v0  ;;  %2479 = vmatpush.msra.mxu3 %v1823_v19  ;;  %v1631_v26 = vmul.f32 %v1119_v61, %v3335_v8  ;;  %v854_v32 = vsel %vm853_vm10, %v4020_v30, %v4026_v51  ;;  %vm5048_vm9 = vmmov %vm5033_vm1  ;;  %v5051_v0 = vld [vmem:[#allocation11_spill] sm:$0xff] }
 0x10a   : > { %2395 = vst [vmem:[#allocation1] ss:$2 sm:$0xff] %v2135_v29  ;;  %2460 = vmatpush.msra.mxu2 %v1755_v39  ;;  %v4340_v27 = vrot.slane %v1054_v47, 1  ;;  %v856_v33 = vsel %vm5047_vm15, %v4037_v13, %v4039_v17  ;;  %v1751_v57 = vmul.f32 %v1239_v53, %v3335_v8  ;;  %v928_v1 = vsel %vm853_vm10, %v4084_v6, %v4094_v49  ;;  %v4363_v29 = vld.sshfl [vmem:[#allocation1 + $0x10] sm:$0xff pattern:$0x75316420] }
 0x10b   : > { %v1695_v18 = vmul.f32 %v1183_v22, %v3335_v8  ;;  %v858_v48 = vsel %vm5048_vm9, %v854_v32, %v856_v33  ;;  %2419 = vmatpush.msra.mxu0 %v1631_v26  ;;  %v929_v41 = vsel %vm5032_vm0, %v4096_v45, %v4098_v50  ;;  %v1049_v35 = vsel %vm847_vm13, %v3953_v16, %v3961_v34  ;;  %v5052_v53 = vld [vmem:[#allocation12_spill] sm:$0xff] }
 0x10c   : > { %5046 = vst [vmem:[#allocation7_spill] sm:$0xff] %v4340_v27  ;;  %v1307_v44 = vperm.slane %v4340_v27, 0  ;;  %v4355_v39 = vrot.slane %v858_v48, 1  ;;  %2461 = vmatpush.msra.mxu2 %v1751_v57  ;;  %v930_v19 = vsel %vm5033_vm1, %v928_v1, %v929_v41  ;;  %v1050_v61 = vsel %vm849_vm4, %v3963_v38, %v3968_v9  ;;  %v5056_v41 = vld [vmem:[#allocation13_spill] sm:$0xff] }
 0x10d   : > { %5050 = vst [vmem:[#allocation48_spill] sm:$0xff] %v4363_v29  ;;  %2439 = vmatpush.msra.mxu1 %v1695_v18  ;;  %v1296_v22 = vperm.slane %v5051_v0, 1  ;;  %v1364_v47 = vperm.slane %v5052_v53, 1  ;;  %v4373_v16 = vrot.slane %v930_v19, 1  ;;  %v4376_v34 = vsel %vm851_vm7, %v1049_v35, %v1050_v61  ;;  %2462 = vmatmul.f32.vlgmr.msra.gmra.mxu2 %v4363_v29 }
 0x10e   : > { %5049 = vst [vmem:[#allocation47_spill] sm:$0xff] %v4355_v39  ;;  %v1819_v26 = vmul.f32 %v1307_v44, %v3335_v8  ;;  %2526 = vmatpush.msrb.mxu2 %v1812_v25  ;;  %v1115_v32 = vperm.slane %v4355_v39, 0  ;;  %v1303_v33 = vperm.slane %v4376_v34, 0  ;;  %v848_v9 = vsel %vm847_vm13, %v4020_v30, %v4026_v51  ;;  %v4407_v61 = vld.sshfl [vmem:[#allocation1 + $0x18] sm:$0xff pattern:$0x75316420] }
 0x10f   : > { %5053 = vst [vmem:[#allocation49_spill] sm:$0xff] %v4373_v16  ;;  %v1808_v18 = vmul.f32 %v1296_v22, %v5045_v4  ;;  %v1876_v38 = vmul.f32 %v1364_v47, %v5045_v4  ;;  %v1179_v57 = vperm.slane %v4373_v16, 0  ;;  %v850_v48 = vsel %vm849_vm4, %v4037_v13, %v4039_v17 }
 0x110   : > { %5054 = vst [vmem:[#allocation50_spill] sm:$0xff] %v4376_v34  ;;  %2480 = vmatpush.msra.mxu3 %v1819_v26  ;;  %v1627_v25 = vmul.f32 %v1115_v32, %v3335_v8  ;;  %v925_v1 = vsel %vm847_vm13, %v4084_v6, %v4094_v49  ;;  %v1815_v44 = vmul.f32 %v1303_v33, %v3335_v8  ;;  %v1172_v35 = vperm.slane %v5056_v41, 1  ;;  %v5058_v6 = vld [vmem:[#allocation17_spill] sm:$0xff]  ;;  %v5061_v26 = vld [vmem:[#allocation15_spill] sm:$0xff] }
 0x111   : > { %2527 = vmatpush.msrb.mxu2 %v1808_v18  ;;  %v4395_v51 = vsel %vm851_vm7, %v848_v9, %v850_v48  ;;  %v926_v30 = vsel %vm849_vm4, %v4096_v45, %v4098_v50  ;;  %v1691_v19 = vmul.f32 %v1179_v57, %v3335_v8  ;;  %v1236_v49 = vperm.slane %v5058_v6, 1  ;;  %5059 = vst [vmem:[#allocation53_spill] sm:$0xff] %v4407_v61  ;;  %v5060_v45 = vld [vmem:[#allocation14_spill] sm:$0xff]  ;;  %v5062_v9 = vld [vmem:[#allocation16_spill] sm:$0xff] }
 0x112   : > { %5055 = vst [vmem:[#allocation51_spill] sm:$0xff] %v4395_v51  ;;  %2420 = vmatpush.msra.mxu0 %v1627_v25  ;;  %v1111_v13 = vperm.slane %v4395_v51, 0  ;;  %v4404_v17 = vsel %vm851_vm7, %v925_v1, %v926_v30  ;;  %2481 = vmatpush.msra.mxu3 %v1815_v44  ;;  %v1684_v47 = vmul.f32 %v1172_v35, %v5045_v4  ;;  %v1292_v50 = vperm.slane %v5060_v45, 1  ;;  %v5063_v57 = vld [vmem:[#allocation18_spill] sm:$0xff]  ;;  %v5064_v35 = vld [vmem:[#allocation19_spill] sm:$0xff] }
 0x113   : > { %5057 = vst [vmem:[#allocation52_spill] sm:$0xff] %v4404_v17  ;;  %v1175_v22 = vperm.slane %v4404_v17, 0  ;;  %v1360_v32 = vperm.slane %v5061_v26, 1  ;;  %2440 = vmatpush.msra.mxu1 %v1691_v19  ;;  %v1748_v18 = vmul.f32 %v1236_v49, %v5045_v4  ;;  %v1168_v25 = vperm.slane %v5062_v9, 1  ;;  %2482 = vmatmul.f32.vlgmr.msra.gmra.mxu3 %v4407_v61  ;;  %v5066_v9 = vld [vmem:[#allocation21_spill] sm:$0xff] }
 0x114   : > { %2546 = vmatpush.msrb.mxu3 %v1876_v38  ;;  %v1623_v33 = vmul.f32 %v1111_v13, %v3335_v8  ;;  %v1232_v48 = vperm.slane %v5063_v57, 1  ;;  %v1804_v44 = vmul.f32 %v1292_v50, %v5045_v4  ;;  %v1288_v29 = vperm.slane %v5064_v35, 1  ;;  %v5065_v13 = vld [vmem:[#allocation20_spill] sm:$0xff] }
 0x115   : > { %v1687_v1 = vmul.f32 %v1175_v22, %v3335_v8  ;;  %v1872_v30 = vmul.f32 %v1360_v32, %v5045_v4  ;;  %v1680_v38 = vmul.f32 %v1168_v25, %v5045_v4  ;;  %v1356_v49 = vperm.slane %v5065_v13, 1  ;;  %v5067_v22 = vld [vmem:[#allocation22_spill] sm:$0xff]  ;;  %v5068_v32 = vld [vmem:[#allocation23_spill] sm:$0xff]  ;;  %v5069_v35 = vld [vmem:[#allocation24_spill] sm:$0xff] }
 0x116   : > { %2421 = vmatpush.msra.mxu0 %v1623_v33  ;;  %v1744_v19 = vmul.f32 %v1232_v48, %v5045_v4  ;;  %v1164_v26 = vperm.slane %v5066_v9, 1  ;;  %v1800_v8 = vmul.f32 %v1288_v29, %v5045_v4  ;;  %v1228_v50 = vperm.slane %v5067_v22, 1  ;;  %2528 = vmatpush.msrb.mxu2 %v1804_v44  ;;  %v5070_v48 = vld [vmem:[#allocation25_spill] sm:$0xff]  ;;  %v5071_v13 = vld [vmem:[#allocation26_spill] sm:$0xff]  ;;  %v5073_v44 = vld [vmem:[#allocation28_spill] sm:$0xff] }
 0x117   : > { %2441 = vmatpush.msra.mxu1 %v1687_v1  ;;  %v1284_v57 = vperm.slane %v5068_v32, 1  ;;  %v1352_v45 = vperm.slane %v5069_v35, 1  ;;  %v1868_v33 = vmul.f32 %v1356_v49, %v5045_v4  ;;  %v1160_v61 = vperm.slane %v5070_v48, 1  ;;  %2547 = vmatpush.msrb.mxu3 %v1872_v30  ;;  %v5072_v32 = vld [vmem:[#allocation27_spill] sm:$0xff]  ;;  %v5074_v48 = vld [vmem:[#allocation29_spill] sm:$0xff] }
 0x118   : > { %2486 = vmatpush.msrb.mxu0 %v1684_v47  ;;  %v1676_v25 = vmul.f32 %v1164_v26, %v5045_v4  ;;  %v1224_v9 = vperm.slane %v5071_v13, 1  ;;  %v1740_v29 = vmul.f32 %v1228_v50, %v5045_v4  ;;  %v1280_v35 = vperm.slane %v5072_v32, 1  ;;  %2529 = vmatpush.msrb.mxu2 %v1800_v8  ;;  %v5076_v50 = vld [vmem:[#allocation31_spill] sm:$0xff] }
 0x119   : > { %2506 = vmatpush.msrb.mxu1 %v1748_v18  ;;  %v1796_v47 = vmul.f32 %v1284_v57, %v5045_v4  ;;  %v1864_v1 = vmul.f32 %v1352_v45, %v5045_v4  ;;  %v1672_v18 = vmul.f32 %v1160_v61, %v5045_v4  ;;  %v1348_v49 = vperm.slane %v5073_v44, 1  ;;  %2548 = vmatpush.msrb.mxu3 %v1868_v33 }
 0x11a   : > { %2487 = vmatpush.msrb.mxu0 %v1680_v38  ;;  %v1736_v26 = vmul.f32 %v1224_v9, %v5045_v4  ;;  %v1156_v13 = vperm.slane %v5074_v48, 1  ;;  %v1792_v30 = vmul.f32 %v1280_v35, %v5045_v4  ;;  %v5075_v38 = vld [vmem:[#allocation30_spill] sm:$0xff]  ;;  %v1276_v45 = vperm.slane %v5076_v50, 1 }
 0x11b   : > { %2507 = vmatpush.msrb.mxu1 %v1744_v19  ;;  %v1220_v57 = vperm.slane %v5075_v38, 1  ;;  %v1344_v32 = vperm.slane %v3737_v21, 1  ;;  %2530 = vmatpush.msrb.mxu2 %v1796_v47  ;;  %v1860_v61 = vmul.f32 %v1348_v49, %v5045_v4  ;;  %v1152_v19 = vperm.slane %v3752_v12, 1  ;;  %v5077_v47 = vld [vmem:[#allocation36_spill] sm:$0xff]  ;;  %v5078_v12 = vld [vmem:[#allocation37_spill] sm:$0xff] }
 0x11c   : > { %2488 = vmatpush.msrb.mxu0 %v1676_v25  ;;  %v1668_v9 = vmul.f32 %v1156_v13, %v5045_v4  ;;  %v1216_v8 = vperm.slane %v3755_v52, 1  ;;  %2549 = vmatpush.msrb.mxu3 %v1864_v1  ;;  %v1788_v33 = vmul.f32 %v1276_v45, %v5045_v4  ;;  %v1272_v21 = vperm.slane %v3769_v37, 1 }
 0x11d   : > { %2508 = vmatpush.msrb.mxu1 %v1740_v29  ;;  %v1732_v35 = vmul.f32 %v1220_v57, %v5045_v4  ;;  %v1856_v25 = vmul.f32 %v1344_v32, %v5045_v4  ;;  %2531 = vmatpush.msrb.mxu2 %v1792_v30  ;;  %v1664_v29 = vmul.f32 %v1152_v19, %v5045_v4  ;;  %v1340_v49 = vperm.slane %v5077_v47, 1  ;;  %v5080_v19 = vld [vmem:[#allocation39_spill] sm:$0xff]  ;;  %v5081_v47 = vld [vmem:[#allocation40_spill] sm:$0xff] }
 0x11e   : > { %2489 = vmatpush.msrb.mxu0 %v1672_v18  ;;  %v1728_v13 = vmul.f32 %v1216_v8, %v5045_v4  ;;  %v1148_v52 = vperm.slane %v5078_v12, 1  ;;  %2550 = vmatpush.msrb.mxu3 %v1860_v61  ;;  %v1784_v1 = vmul.f32 %v1272_v21, %v5045_v4  ;;  %v5079_v18 = vld [vmem:[#allocation38_spill] sm:$0xff]  ;;  %v1268_v32 = vperm.slane %v3900_v20, 1 }
 0x11f   : > { %2509 = vmatpush.msrb.mxu1 %v1736_v26  ;;  %v1212_v57 = vperm.slane %v5079_v18, 1  ;;  %v1336_v45 = vperm.slane %v3851_v10, 1  ;;  %2532 = vmatpush.msrb.mxu2 %v1788_v33  ;;  %v1852_v26 = vmul.f32 %v1340_v49, %v5045_v4  ;;  %v1144_v8 = vperm.slane %v5080_v19, 1  ;;  %v5082_v20 = vld [vmem:[#allocation42_spill] sm:$0xff]  ;;  %v5083_v33 = vld [vmem:[#allocation43_spill] sm:$0xff] }
 0x120   : > { %2490 = vmatpush.msrb.mxu0 %v1668_v9  ;;  %v1660_v30 = vmul.f32 %v1148_v52, %v5045_v4  ;;  %v1208_v12 = vperm.slane %v5081_v47, 1  ;;  %2551 = vmatpush.msrb.mxu3 %v1856_v25  ;;  %v1780_v61 = vmul.f32 %v1268_v32, %v5045_v4  ;;  %v1264_v10 = vperm.slane %v5082_v20, 1 }
 0x121   : > { %2510 = vmatpush.msrb.mxu1 %v1732_v35  ;;  %v1724_v21 = vmul.f32 %v1212_v57, %v5045_v4  ;;  %v1848_v9 = vmul.f32 %v1336_v45, %v5045_v4  ;;  %2533 = vmatpush.msrb.mxu2 %v1784_v1  ;;  %v1656_v35 = vmul.f32 %v1144_v8, %v5045_v4  ;;  %v1332_v49 = vperm.slane %v5083_v33, 1 }
 0x122   : > { %2491 = vmatpush.msrb.mxu0 %v1664_v29  ;;  %v1720_v52 = vmul.f32 %v1208_v12, %v5045_v4  ;;  %v1140_v47 = vperm.slane %v4059_v62, 1  ;;  %2552 = vmatpush.msrb.mxu3 %v1852_v26  ;;  %v1776_v25 = vmul.f32 %v1264_v10, %v5045_v4  ;;  %v1204_v29 = vperm.slane %v4128_v2, 1 }
 0x123   : > { %2511 = vmatpush.msrb.mxu1 %v1728_v13  ;;  %v1260_v57 = vperm.slane %v4100_v28, 1  ;;  %v1328_v32 = vperm.slane %v4102_v55, 1  ;;  %2534 = vmatpush.msrb.mxu2 %v1780_v61  ;;  %v1844_v13 = vmul.f32 %v1332_v49, %v5045_v4  ;;  %v1136_v1 = vperm.slane %v4118_v60, 1 }
 0x124   : > { %2492 = vmatpush.msrb.mxu0 %v1660_v30  ;;  %v1652_v12 = vmul.f32 %v1140_v47, %v5045_v4  ;;  %v1200_v45 = vperm.slane %v4134_v14, 1  ;;  %2553 = vmatpush.msrb.mxu3 %v1848_v9  ;;  %v1716_v10 = vmul.f32 %v1204_v29, %v5045_v4  ;;  %v1256_v8 = vperm.slane %v4142_v31, 1 }
 0x125   : > { %2512 = vmatpush.msrb.mxu1 %v1724_v21  ;;  %v1772_v26 = vmul.f32 %v1260_v57, %v5045_v4  ;;  %v1840_v30 = vmul.f32 %v1328_v32, %v5045_v4  ;;  %2535 = vmatpush.msrb.mxu2 %v1776_v25  ;;  %v1648_v21 = vmul.f32 %v1136_v1, %v5045_v4  ;;  %v1324_v61 = vperm.slane %v4157_v5, 1 }
 0x126   : > { %2493 = vmatpush.msrb.mxu0 %v1656_v35  ;;  %v1712_v47 = vmul.f32 %v1200_v45, %v5045_v4  ;;  %v1132_v49 = vperm.slane %v4161_v7, 1  ;;  %2554 = vmatpush.msrb.mxu3 %v1844_v13  ;;  %v1768_v9 = vmul.f32 %v1256_v8, %v5045_v4  ;;  %v1196_v35 = vperm.slane %v4176_v11, 1 }
 0x127   : > { %2513 = vmatpush.msrb.mxu1 %v1720_v52  ;;  %v1252_v29 = vperm.slane %v4192_v42, 1  ;;  %v1320_v57 = vperm.slane %v4195_v24, 1  ;;  %2536 = vmatpush.msrb.mxu2 %v1772_v26  ;;  %v1836_v52 = vmul.f32 %v1324_v61, %v5045_v4  ;;  %v1128_v32 = vperm.slane %v4213_v58, 1 }
 0x128   : > { %2494 = vmatpush.msrb.mxu0 %v1652_v12  ;;  %v1644_v25 = vmul.f32 %v1132_v49, %v5045_v4  ;;  %v1192_v1 = vperm.slane %v4220_v36, 1  ;;  %2555 = vmatpush.msrb.mxu3 %v1840_v30  ;;  %v1708_v13 = vmul.f32 %v1196_v35, %v5045_v4  ;;  %v1248_v8 = vperm.slane %v4235_v15, 1 }
 0x129   : > { %2514 = vmatpush.msrb.mxu1 %v1716_v10  ;;  %v1764_v12 = vmul.f32 %v1252_v29, %v5045_v4  ;;  %v1832_v45 = vmul.f32 %v1320_v57, %v5045_v4  ;;  %2537 = vmatpush.msrb.mxu2 %v1768_v9  ;;  %v1640_v10 = vmul.f32 %v1128_v32, %v5045_v4  ;;  %v1316_v61 = vperm.slane %v4242_v3, 1  ;;  %v4511_v9 = vld.sshfl [vmem:[#allocation1] sm:$0xff pattern:$0x75316420] }
 0x12a   : > { %2495 = vmatpush.msrb.mxu0 %v1648_v21  ;;  %v1704_v26 = vmul.f32 %v1192_v1, %v5045_v4  ;;  %v1124_v49 = vperm.slane %v4257_v43, 1  ;;  %2556 = vmatpush.msrb.mxu3 %v1836_v52  ;;  %v1760_v30 = vmul.f32 %v1248_v8, %v5045_v4  ;;  %v1188_v21 = vperm.slane %v4271_v46, 1  ;;  %5084 = vst [vmem:[#allocation22_spill] sm:$0xff] %v4511_v9 }
 0x12b   : > { %2515 = vmatpush.msrb.mxu1 %v1712_v47  ;;  %v1244_v35 = vperm.slane %v4286_v54, 1  ;;  %v1312_v29 = vperm.slane %v4294_v23, 1  ;;  %2538 = vmatpush.msrb.mxu2 %v1764_v12  ;;  %v1828_v47 = vmul.f32 %v1316_v61, %v5045_v4  ;;  %v1120_v32 = vperm.slane %v4309_v59, 1 }
 0x12c   : > { %2496 = vmatpush.msrb.mxu0 %v1644_v25  ;;  %v1636_v57 = vmul.f32 %v1124_v49, %v5045_v4  ;;  %v1184_v52 = vperm.slane %v4316_v40, 1  ;;  %2557 = vmatpush.msrb.mxu3 %v1832_v45  ;;  %v4516_v25 = vld.sshfl [vmem:[#allocation1 + $0x8] sm:$0xff pattern:$0x75316420]  ;;  %v1700_v1 = vmul.f32 %v1188_v21, %v5045_v4  ;;  %v1240_v12 = vperm.slane %v4328_v56, 1 }
 0x12d   : > { %2516 = vmatpush.msrb.mxu1 %v1708_v13  ;;  %5085 = vst [vmem:[#allocation30_spill] sm:$0xff] %v4516_v25  ;;  %v1756_v8 = vmul.f32 %v1244_v35, %v5045_v4  ;;  %v1824_v13 = vmul.f32 %v1312_v29, %v5045_v4  ;;  %2539 = vmatpush.msrb.mxu2 %v1760_v30  ;;  %v1308_v40 = vperm.slane %v4340_v27, 1  ;;  %v1301_v45 = vperm.slane %v5016_v63, 2 }
 0x12e   : > { %2497 = vmatpush.msrb.mxu0 %v1640_v10  ;;  %v1632_v61 = vmul.f32 %v1120_v32, %v5045_v4  ;;  %v1696_v49 = vmul.f32 %v1184_v52, %v5045_v4  ;;  %2558 = vmatpush.msrb.mxu3 %v1828_v47  ;;  %v1752_v10 = vmul.f32 %v1240_v12, %v5045_v4  ;;  %v1116_v21 = vperm.slane %v4355_v39, 1  ;;  %v5086_v47 = vld [vmem:[#allocation8_spill] sm:$0xff] }
 0x12f   : > { %2517 = vmatpush.msrb.mxu1 %v1704_v26  ;;  %2422 = vmatmul.f32.vlgmr.msra.gmra.mxu0 %v4511_v9  ;;  %v1180_v35 = vperm.slane %v4373_v16, 1  ;;  %v1304_v26 = vperm.slane %v4376_v34, 1  ;;  %v1820_v30 = vmul.f32 %v1308_v40, %v5045_v4  ;;  %v1297_v29 = vperm.slane %v5051_v0, 2  ;;  %v5095_v16 = vld [vmem:[#allocation53_spill] sm:$0xff] }
 0x130   : > { %2442 = vmatmul.f32.vlgmr.msra.gmra.mxu1 %v4516_v25  ;;  %2498 = vmatpush.msrb.mxu0 %v1636_v57  ;;  %v1365_v32 = vperm.slane %v5052_v53, 2  ;;  %v1813_v52 = vmul.f32 %v1301_v45, %v5086_v47  ;;  %v1628_v12 = vmul.f32 %v1116_v21, %v5045_v4  ;;  %v1112_v39 = vperm.slane %v4395_v51, 1  ;;  %v5087_v45 = vld [vmem:[#allocation14_spill] sm:$0xff]  ;;  %v5088_v51 = vld [vmem:[#allocation48_spill] sm:$0xff] }
 0x131   : > { %2518 = vmatpush.msrb.mxu1 %v1700_v1  ;;  %2540 = vmatpush.msrb.mxu2 %v1756_v8  ;;  %v1692_v34 = vmul.f32 %v1180_v35, %v5045_v4  ;;  %v1816_v57 = vmul.f32 %v1304_v26, %v5045_v4  ;;  %v1176_v40 = vperm.slane %v4404_v17, 1  ;;  %v1173_v0 = vperm.slane %v5056_v41, 2  ;;  %v5089_v35 = vld [vmem:[#allocation15_spill] sm:$0xff]  ;;  %v5090_v17 = vld [vmem:[#allocation16_spill] sm:$0xff] }
 0x132   : > { %2559 = vmatpush.msrb.mxu3 %v1824_v13  ;;  %2499 = vmatpush.msrb.mxu0 %v1632_v61  ;;  %v1809_v1 = vmul.f32 %v1297_v29, %v5086_v47  ;;  %v1237_v8 = vperm.slane %v5058_v6, 2  ;;  %v1293_v21 = vperm.slane %v5087_v45, 2  ;;  %v1877_v13 = vmul.f32 %v1365_v32, %v5086_v47  ;;  %v5092_v6 = vld [vmem:[#allocation19_spill] sm:$0xff]  ;;  %v5094_v45 = vld [vmem:[#allocation21_spill] sm:$0xff] }
 0x133   : > { %2519 = vmatpush.msrb.mxu1 %v1696_v49  ;;  %2541 = vmatpush.msrb.mxu2 %v1752_v10  ;;  %v1624_v61 = vmul.f32 %v1112_v39, %v5045_v4  ;;  %v1361_v26 = vperm.slane %v5089_v35, 2  ;;  %v1169_v53 = vperm.slane %v5090_v17, 2  ;;  %v1688_v49 = vmul.f32 %v1176_v40, %v5045_v4  ;;  %v5091_v10 = vld [vmem:[#allocation18_spill] sm:$0xff]  ;;  %v5096_v40 = vld [vmem:[#allocation23_spill] sm:$0xff] }
 0x134   : > { %2560 = vmatpush.msrb.mxu3 %v1820_v30  ;;  %2542 = vmatmul.f32.vlgmr.msrb.gmra.mxu2 %v5088_v51  ;;  %v1233_v29 = vperm.slane %v5091_v10, 2  ;;  %v1289_v41 = vperm.slane %v5092_v6, 2  ;;  %v1685_v51 = vmul.f32 %v1173_v0, %v5086_v47  ;;  %v5093_v30 = vld [vmem:[#allocation20_spill] sm:$0xff]  ;;  %v1165_v39 = vperm.slane %v5094_v45, 2  ;;  %v5098_v45 = vld [vmem:[#allocation25_spill] sm:$0xff] }
 0x135   : > { %2606 = vmatpush.msra.mxu2 %v1813_v52  ;;  %2500 = vmatpush.msrb.mxu0 %v1628_v12  ;;  %v1357_v32 = vperm.slane %v5093_v30, 2  ;;  %v1749_v52 = vmul.f32 %v1237_v8, %v5086_v47  ;;  %v1805_v12 = vmul.f32 %v1293_v21, %v5086_v47  ;;  %v1229_v4 = vperm.slane %v5067_v22, 2  ;;  %v5099_v8 = vld [vmem:[#allocation26_spill] sm:$0xff] }
 0x136   : > { %2520 = vmatpush.msrb.mxu1 %v1692_v34  ;;  %2561 = vmatpush.msrb.mxu3 %v1816_v57  ;;  %v1285_v10 = vperm.slane %v5096_v40, 2  ;;  %v1873_v34 = vmul.f32 %v1361_v26, %v5086_v47  ;;  %v1681_v0 = vmul.f32 %v1169_v53, %v5086_v47  ;;  %v5097_v57 = vld [vmem:[#allocation24_spill] sm:$0xff]  ;;  %v1161_v6 = vperm.slane %v5098_v45, 2  ;;  %v5100_v40 = vld [vmem:[#allocation27_spill] sm:$0xff] }
 0x137   : > { %2562 = vmatmul.f32.vlgmr.msrb.gmra.mxu3 %v5095_v16  ;;  %2607 = vmatpush.msra.mxu2 %v1809_v1  ;;  %v1353_v30 = vperm.slane %v5097_v57, 2  ;;  %v1745_v16 = vmul.f32 %v1233_v29, %v5086_v47  ;;  %v1801_v1 = vmul.f32 %v1289_v41, %v5086_v47  ;;  %v1225_v21 = vperm.slane %v5099_v8, 2 }
 0x138   : > { %2626 = vmatpush.msra.mxu3 %v1877_v13  ;;  %2501 = vmatpush.msrb.mxu0 %v1624_v61  ;;  %v1281_v13 = vperm.slane %v5100_v40, 2  ;;  %v1869_v53 = vmul.f32 %v1357_v32, %v5086_v47  ;;  %v1677_v61 = vmul.f32 %v1165_v39, %v5086_v47  ;;  %v1349_v26 = vperm.slane %v5073_v44, 2  ;;  %v5101_v39 = vld [vmem:[#allocation32_spill] sm:$0xff]  ;;  %v5102_v44 = vld [vmem:[#allocation33_spill] sm:$0xff] }
 0x139   : > { %2521 = vmatpush.msrb.mxu1 %v1688_v49  ;;  %2502 = vmatmul.f32.vlgmr.msrb.gmra.mxu0 %v4511_v9  ;;  %v1157_v49 = vperm.slane %v5074_v48, 2  ;;  %v1741_v29 = vmul.f32 %v1229_v4, %v5086_v47  ;;  %v1797_v41 = vmul.f32 %v1285_v10, %v5086_v47  ;;  %v1221_v9 = vperm.slane %v5075_v38, 2 }
 0x13a   : > { %2522 = vmatmul.f32.vlgmr.msrb.gmra.mxu1 %v4516_v25  ;;  %2566 = vmatpush.msra.mxu0 %v1685_v51  ;;  %v1277_v40 = vperm.slane %v5076_v50, 2  ;;  %v1865_v51 = vmul.f32 %v1353_v30, %v5086_v47  ;;  %v1673_v32 = vmul.f32 %v1161_v6, %v5086_v47  ;;  %v1345_v25 = vperm.slane %v5101_v39, 2  ;;  %v5105_v39 = vld [vmem:[#allocation37_spill] sm:$0xff] }
 0x13b   : > { %2586 = vmatpush.msra.mxu1 %v1749_v52  ;;  %2608 = vmatpush.msra.mxu2 %v1805_v12  ;;  %v1153_v48 = vperm.slane %v5102_v44, 2  ;;  %v1737_v52 = vmul.f32 %v1225_v21, %v5086_v47  ;;  %v1793_v10 = vmul.f32 %v1281_v13, %v5086_v47  ;;  %v5103_v12 = vld [vmem:[#allocation34_spill] sm:$0xff]  ;;  %v1273_v50 = vperm.slane %v3769_v37, 2  ;;  %v5106_v13 = vld [vmem:[#allocation41_spill] sm:$0xff] }
 0x13c   : > { %2627 = vmatpush.msra.mxu3 %v1873_v34  ;;  %2567 = vmatpush.msra.mxu0 %v1681_v0  ;;  %v1217_v4 = vperm.slane %v5103_v12, 2  ;;  %v1861_v30 = vmul.f32 %v1349_v26, %v5086_v47  ;;  %v1669_v6 = vmul.f32 %v1157_v49, %v5086_v47  ;;  %v5104_v34 = vld [vmem:[#allocation36_spill] sm:$0xff]  ;;  %v1149_v44 = vperm.slane %v5105_v39, 2  ;;  %v5107_v26 = vld [vmem:[#allocation6_spill] sm:$0xff] }
 0x13d   : > { %2587 = vmatpush.msra.mxu1 %v1745_v16  ;;  %2609 = vmatpush.msra.mxu2 %v1801_v1  ;;  %v1341_v0 = vperm.slane %v5104_v34, 2  ;;  %v1733_v16 = vmul.f32 %v1221_v9, %v5086_v47  ;;  %v1789_v1 = vmul.f32 %v1277_v40, %v5086_v47  ;;  %v1213_v21 = vperm.slane %v5079_v18, 2 }
 0x13e   : > { %2628 = vmatpush.msra.mxu3 %v1869_v53  ;;  %2568 = vmatpush.msra.mxu0 %v1677_v61  ;;  %v1269_v37 = vperm.slane %v5106_v13, 2  ;;  %v1857_v53 = vmul.f32 %v1345_v25, %v5086_v47  ;;  %v1665_v61 = vmul.f32 %v1153_v48, %v5086_v47  ;;  %v1337_v49 = vperm.slane %v5107_v26, 2 }
 0x13f   : > { %2588 = vmatpush.msra.mxu1 %v1741_v29  ;;  %2610 = vmatpush.msra.mxu2 %v1797_v41  ;;  %v1145_v39 = vperm.slane %v5080_v19, 2  ;;  %v1729_v9 = vmul.f32 %v1217_v4, %v5086_v47  ;;  %v1785_v40 = vmul.f32 %v1273_v50, %v5086_v47  ;;  %v5108_v29 = vld [vmem:[#allocation40_spill] sm:$0xff]  ;;  %v1265_v13 = vperm.slane %v5082_v20, 2 }
 0x140   : > { %2629 = vmatpush.msra.mxu3 %v1865_v51  ;;  %2569 = vmatpush.msra.mxu0 %v1673_v32  ;;  %v1209_v41 = vperm.slane %v5108_v29, 2  ;;  %v1853_v25 = vmul.f32 %v1341_v0, %v5086_v47  ;;  %v1661_v48 = vmul.f32 %v1149_v44, %v5086_v47  ;;  %v1333_v51 = vperm.slane %v5083_v33, 2 }
 0x141   : > { %2589 = vmatpush.msra.mxu1 %v1737_v52  ;;  %2611 = vmatpush.msra.mxu2 %v1793_v10  ;;  %v1141_v32 = vperm.slane %v4059_v62, 2  ;;  %v1725_v52 = vmul.f32 %v1213_v21, %v5086_v47  ;;  %v1781_v50 = vmul.f32 %v1269_v37, %v5086_v47  ;;  %v1205_v10 = vperm.slane %v4128_v2, 2 }
 0x142   : > { %2630 = vmatpush.msra.mxu3 %v1861_v30  ;;  %2570 = vmatpush.msra.mxu0 %v1669_v6  ;;  %v1261_v4 = vperm.slane %v4100_v28, 2  ;;  %v1849_v30 = vmul.f32 %v1337_v49, %v5086_v47  ;;  %v1657_v44 = vmul.f32 %v1145_v39, %v5086_v47  ;;  %v1329_v6 = vperm.slane %v4102_v55, 2 }
 0x143   : > { %2590 = vmatpush.msra.mxu1 %v1733_v16  ;;  %2612 = vmatpush.msra.mxu2 %v1789_v1  ;;  %v1137_v0 = vperm.slane %v4118_v60, 2  ;;  %v1721_v16 = vmul.f32 %v1209_v41, %v5086_v47  ;;  %v1777_v37 = vmul.f32 %v1265_v13, %v5086_v47  ;;  %v1201_v1 = vperm.slane %v4134_v14, 2 }
 0x144   : > { %2631 = vmatpush.msra.mxu3 %v1857_v53  ;;  %2571 = vmatpush.msra.mxu0 %v1665_v61  ;;  %v1257_v21 = vperm.slane %v4142_v31, 2  ;;  %v1845_v53 = vmul.f32 %v1333_v51, %v5086_v47  ;;  %v1653_v39 = vmul.f32 %v1141_v32, %v5086_v47  ;;  %v1325_v61 = vperm.slane %v4157_v5, 2 }
 0x145   : > { %2591 = vmatpush.msra.mxu1 %v1729_v9  ;;  %2613 = vmatpush.msra.mxu2 %v1785_v40  ;;  %v1133_v49 = vperm.slane %v4161_v7, 2  ;;  %v1717_v9 = vmul.f32 %v1205_v10, %v5086_v47  ;;  %v1773_v13 = vmul.f32 %v1261_v4, %v5086_v47  ;;  %v1197_v40 = vperm.slane %v4176_v11, 2 }
 0x146   : > { %2632 = vmatpush.msra.mxu3 %v1853_v25  ;;  %2572 = vmatpush.msra.mxu0 %v1661_v48  ;;  %v1253_v41 = vperm.slane %v4192_v42, 2  ;;  %v1841_v25 = vmul.f32 %v1329_v6, %v5086_v47  ;;  %v1649_v48 = vmul.f32 %v1137_v0, %v5086_v47  ;;  %v1321_v51 = vperm.slane %v4195_v24, 2 }
 0x147   : > { %2592 = vmatpush.msra.mxu1 %v1725_v52  ;;  %2614 = vmatpush.msra.mxu2 %v1781_v50  ;;  %v1129_v32 = vperm.slane %v4213_v58, 2  ;;  %v1713_v52 = vmul.f32 %v1201_v1, %v5086_v47  ;;  %v1769_v50 = vmul.f32 %v1257_v21, %v5086_v47  ;;  %v1193_v10 = vperm.slane %v4220_v36, 2 }
 0x148   : > { %2633 = vmatpush.msra.mxu3 %v1849_v30  ;;  %2573 = vmatpush.msra.mxu0 %v1657_v44  ;;  %v1249_v4 = vperm.slane %v4235_v15, 2  ;;  %v1837_v30 = vmul.f32 %v1325_v61, %v5086_v47  ;;  %v1645_v44 = vmul.f32 %v1133_v49, %v5086_v47  ;;  %v1317_v6 = vperm.slane %v4242_v3, 2 }
 0x149   : > { %2593 = vmatpush.msra.mxu1 %v1721_v16  ;;  %2615 = vmatpush.msra.mxu2 %v1777_v37  ;;  %v1125_v0 = vperm.slane %v4257_v43, 2  ;;  %v1709_v16 = vmul.f32 %v1197_v40, %v5086_v47  ;;  %v1765_v37 = vmul.f32 %v1253_v41, %v5086_v47  ;;  %v1189_v1 = vperm.slane %v4271_v46, 2  ;;  %v5109_v40 = vld [vmem:[#allocation45_spill] sm:$0xff] }
 0x14a   : > { %2634 = vmatpush.msra.mxu3 %v1845_v53  ;;  %2574 = vmatpush.msra.mxu0 %v1653_v39  ;;  %v1245_v21 = vperm.slane %v4286_v54, 2  ;;  %v1833_v53 = vmul.f32 %v1321_v51, %v5086_v47  ;;  %v1641_v39 = vmul.f32 %v1129_v32, %v5086_v47  ;;  %v1313_v61 = vperm.slane %v4294_v23, 2 }
 0x14b   : > { %2594 = vmatpush.msra.mxu1 %v1717_v9  ;;  %2616 = vmatpush.msra.mxu2 %v1773_v13  ;;  %v1121_v49 = vperm.slane %v4309_v59, 2  ;;  %v1705_v9 = vmul.f32 %v1193_v10, %v5086_v47  ;;  %v1761_v13 = vmul.f32 %v1249_v4, %v5086_v47  ;;  %v1185_v41 = vperm.slane %v5109_v40, 2  ;;  %v5110_v10 = vld [vmem:[#allocation47_spill] sm:$0xff]  ;;  %v5111_v40 = vld [vmem:[#allocation49_spill] sm:$0xff] }
 0x14c   : > { %2635 = vmatpush.msra.mxu3 %v1841_v25  ;;  %2575 = vmatpush.msra.mxu0 %v1649_v48  ;;  %v1241_v54 = vperm.slane %v4328_v56, 2  ;;  %v1829_v25 = vmul.f32 %v1317_v6, %v5086_v47  ;;  %v1637_v48 = vmul.f32 %v1125_v0, %v5086_v47  ;;  %v1309_v51 = vperm.slane %v4340_v27, 2  ;;  %v5112_v6 = vld [vmem:[#allocation50_spill] sm:$0xff]  ;;  %v5113_v27 = vld [vmem:[#allocation11_spill] sm:$0xff]  ;;  %v5118_v59 = vld [vmem:[#allocation13_spill] sm:$0xff] }
 0x14d   : > { %2595 = vmatpush.msra.mxu1 %v1713_v52  ;;  %2617 = vmatpush.msra.mxu2 %v1769_v50  ;;  %v1302_v32 = vperm.slane %v5016_v63, 3  ;;  %v1701_v52 = vmul.f32 %v1189_v1, %v5086_v47  ;;  %v1757_v50 = vmul.f32 %v1245_v21, %v5086_v47  ;;  %v1117_v4 = vperm.slane %v5110_v10, 2  ;;  %v5114_v1 = vld [vmem:[#allocation12_spill] sm:$0xff]  ;;  %v5115_v10 = vld [vmem:[#allocation51_spill] sm:$0xff] }
 0x14e   : > { %2636 = vmatpush.msra.mxu3 %v1837_v30  ;;  %2576 = vmatpush.msra.mxu0 %v1645_v44  ;;  %v1181_v56 = vperm.slane %v5111_v40, 2  ;;  %v1825_v30 = vmul.f32 %v1313_v61, %v5086_v47  ;;  %v1633_v44 = vmul.f32 %v1121_v49, %v5086_v47  ;;  %v1305_v0 = vperm.slane %v5112_v6, 2  ;;  %v5117_v49 = vld [vmem:[#allocation52_spill] sm:$0xff] }
 0x14f   : > { %2596 = vmatpush.msra.mxu1 %v1709_v16  ;;  %2618 = vmatpush.msra.mxu2 %v1765_v37  ;;  %v1298_v63 = vperm.slane %v5113_v27, 3  ;;  %v1697_v16 = vmul.f32 %v1185_v41, %v5086_v47  ;;  %v1753_v37 = vmul.f32 %v1241_v54, %v5086_v47  ;;  %v1366_v21 = vperm.slane %v5114_v1, 3  ;;  %v5120_v1 = vld [vmem:[#allocation14_spill] sm:$0xff] }
 0x150   : > { %2637 = vmatpush.msra.mxu3 %v1833_v53  ;;  %2577 = vmatpush.msra.mxu0 %v1641_v39  ;;  %v1113_v40 = vperm.slane %v5115_v10, 2  ;;  %v1821_v53 = vmul.f32 %v1309_v51, %v5086_v47  ;;  %v5116_v39 = vld [vmem:[#allocation9_spill] sm:$0xff]  ;;  %v1177_v6 = vperm.slane %v5117_v49, 2  ;;  %v1174_v27 = vperm.slane %v5118_v59, 3 }
 0x151   : > { %2597 = vmatpush.msra.mxu1 %v1705_v9  ;;  %2619 = vmatpush.msra.mxu2 %v1761_v13  ;;  %v1814_v61 = vmul.f32 %v1302_v32, %v5116_v39  ;;  %v1629_v9 = vmul.f32 %v1117_v4, %v5086_v47  ;;  %v1693_v54 = vmul.f32 %v1181_v56, %v5086_v47  ;;  %v5119_v13 = vld [vmem:[#allocation17_spill] sm:$0xff]  ;;  %v1294_v10 = vperm.slane %v5120_v1, 3  ;;  %v5122_v4 = vld [vmem:[#allocation19_spill] sm:$0xff] }
 0x152   : > { %2638 = vmatpush.msra.mxu3 %v1829_v25  ;;  %2578 = vmatpush.msra.mxu0 %v1637_v48  ;;  %v1238_v41 = vperm.slane %v5119_v13, 3  ;;  %v1817_v25 = vmul.f32 %v1305_v0, %v5086_v47  ;;  %v1810_v48 = vmul.f32 %v1298_v63, %v5116_v39  ;;  %v1362_v51 = vperm.slane %v5089_v35, 3  ;;  %v5123_v0 = vld [vmem:[#allocation20_spill] sm:$0xff]  ;;  %v5124_v63 = vld [vmem:[#allocation21_spill] sm:$0xff] }
 0x153   : > { %2598 = vmatpush.msra.mxu1 %v1701_v52  ;;  %2620 = vmatpush.msra.mxu2 %v1757_v50  ;;  %v1170_v59 = vperm.slane %v5090_v17, 3  ;;  %v1878_v32 = vmul.f32 %v1366_v21, %v5116_v39  ;;  %v1625_v56 = vmul.f32 %v1113_v40, %v5086_v47  ;;  %v5121_v52 = vld [vmem:[#allocation18_spill] sm:$0xff]  ;;  %v1290_v13 = vperm.slane %v5122_v4, 3  ;;  %v5125_v21 = vld [vmem:[#allocation23_spill] sm:$0xff] }
 0x154   : > { %2639 = vmatpush.msra.mxu3 %v1825_v30  ;;  %2579 = vmatpush.msra.mxu0 %v1633_v44  ;;  %v1234_v50 = vperm.slane %v5121_v52, 3  ;;  %v1689_v30 = vmul.f32 %v1177_v6, %v5086_v47  ;;  %v1686_v44 = vmul.f32 %v1174_v27, %v5116_v39  ;;  %v1358_v35 = vperm.slane %v5123_v0, 3 }
 0x155   : > { %2599 = vmatpush.msra.mxu1 %v1697_v16  ;;  %2621 = vmatpush.msra.mxu2 %v1753_v37  ;;  %v1166_v17 = vperm.slane %v5124_v63, 3  ;;  %v1750_v16 = vmul.f32 %v1238_v41, %v5116_v39  ;;  %v1806_v40 = vmul.f32 %v1294_v10, %v5116_v39  ;;  %v1230_v37 = vperm.slane %v5067_v22, 3 }
 0x156   : > { %2640 = vmatpush.msra.mxu3 %v1821_v53  ;;  %2580 = vmatpush.msra.mxu0 %v1629_v9  ;;  %v1286_v1 = vperm.slane %v5125_v21, 3  ;;  %v1874_v47 = vmul.f32 %v1362_v51, %v5116_v39  ;;  %v1682_v6 = vmul.f32 %v1170_v59, %v5116_v39  ;;  %v1354_v53 = vperm.slane %v5097_v57, 3  ;;  %v5126_v9 = vld [vmem:[#allocation27_spill] sm:$0xff]  ;;  %v5128_v51 = vld [vmem:[#allocation29_spill] sm:$0xff] }
 0x157   : > { %2686 = vmatpush.msrb.mxu2 %v1814_v61  ;;  %2600 = vmatpush.msra.mxu1 %v1693_v54  ;;  %v1162_v61 = vperm.slane %v5098_v45, 3  ;;  %v1746_v27 = vmul.f32 %v1234_v50, %v5116_v39  ;;  %v1802_v10 = vmul.f32 %v1290_v13, %v5116_v39  ;;  %v1226_v22 = vperm.slane %v5099_v8, 3  ;;  %v5130_v13 = vld [vmem:[#allocation32_spill] sm:$0xff] }
 0x158   : > { %2641 = vmatpush.msra.mxu3 %v1817_v25  ;;  %2581 = vmatpush.msra.mxu0 %v1625_v56  ;;  %v1282_v54 = vperm.slane %v5126_v9, 3  ;;  %v1870_v41 = vmul.f32 %v1358_v35, %v5116_v39  ;;  %v1678_v25 = vmul.f32 %v1166_v17, %v5116_v39  ;;  %v1158_v45 = vperm.slane %v5128_v51, 3  ;;  %v5129_v56 = vld [vmem:[#allocation31_spill] sm:$0xff] }
 0x159   : > { %2687 = vmatpush.msrb.mxu2 %v1810_v48  ;;  %2601 = vmatpush.msra.mxu1 %v1689_v30  ;;  %v5127_v48 = vld [vmem:[#allocation28_spill] sm:$0xff]  ;;  %v1742_v59 = vmul.f32 %v1230_v37, %v5116_v39  ;;  %v1222_v8 = vperm.slane %v5075_v38, 3  ;;  %v1278_v52 = vperm.slane %v5129_v56, 3  ;;  %v1866_v50 = vmul.f32 %v1354_v53, %v5116_v39  ;;  %v5132_v17 = vld [vmem:[#allocation35_spill] sm:$0xff] }
 0x15a   : > { %2706 = vmatpush.msrb.mxu3 %v1878_v32  ;;  %2646 = vmatpush.msrb.mxu0 %v1686_v44  ;;  %v1350_v57 = vperm.slane %v5127_v48, 3  ;;  %v1798_v32 = vmul.f32 %v1286_v1, %v5116_v39  ;;  %v1674_v4 = vmul.f32 %v1162_v61, %v5116_v39  ;;  %v1346_v30 = vperm.slane %v5130_v13, 3  ;;  %v5131_v44 = vld [vmem:[#allocation33_spill] sm:$0xff] }
 0x15b   : > { %2666 = vmatpush.msrb.mxu1 %v1750_v16  ;;  %2688 = vmatpush.msrb.mxu2 %v1806_v40  ;;  %v1154_v0 = vperm.slane %v5131_v44, 3  ;;  %v1738_v35 = vmul.f32 %v1226_v22, %v5116_v39  ;;  %v1794_v63 = vmul.f32 %v1282_v54, %v5116_v39  ;;  %v1218_v38 = vperm.slane %v5103_v12, 3  ;;  %v5133_v1 = vld [vmem:[#allocation37_spill] sm:$0xff] }
 0x15c   : > { %2707 = vmatpush.msrb.mxu3 %v1874_v47  ;;  %2647 = vmatpush.msrb.mxu0 %v1682_v6  ;;  %v1274_v16 = vperm.slane %v5132_v17, 3  ;;  %v1862_v40 = vmul.f32 %v1350_v57, %v5116_v39  ;;  %v1670_v37 = vmul.f32 %v1158_v45, %v5116_v39  ;;  %v1342_v21 = vperm.slane %v5104_v34, 3  ;;  %v5134_v61 = vld [vmem:[#allocation41_spill] sm:$0xff] }
 0x15d   : > { %2667 = vmatpush.msrb.mxu1 %v1746_v27  ;;  %2689 = vmatpush.msrb.mxu2 %v1802_v10  ;;  %v1150_v47 = vperm.slane %v5133_v1, 3  ;;  %v1734_v6 = vmul.f32 %v1222_v8, %v5116_v39  ;;  %v1790_v53 = vmul.f32 %v1278_v52, %v5116_v39  ;;  %v1214_v12 = vperm.slane %v5079_v18, 3  ;;  %v2932_v1 = vld.sshfl [vmem:[#allocation1 + $0x10] sm:$0xff pattern:$0x75316420] }
 0x15e   : > { %2708 = vmatpush.msrb.mxu3 %v1870_v41  ;;  %2648 = vmatpush.msrb.mxu0 %v1678_v25  ;;  %v1270_v27 = vperm.slane %v5134_v61, 3  ;;  %v1858_v10 = vmul.f32 %v1346_v30, %v5116_v39  ;;  %v1666_v22 = vmul.f32 %v1154_v0, %v5116_v39  ;;  %v1338_v34 = vperm.slane %v5107_v26, 3  ;;  %v5137_v61 = vld [vmem:[#allocation45_spill] sm:$0xff] }
 0x15f   : > { %2668 = vmatpush.msrb.mxu1 %v1742_v59  ;;  %2690 = vmatpush.msrb.mxu2 %v1798_v32  ;;  %v1146_v9 = vperm.slane %v5080_v19, 3  ;;  %v1730_v54 = vmul.f32 %v1218_v38, %v5116_v39  ;;  %v1786_v41 = vmul.f32 %v1274_v16, %v5116_v39  ;;  %v1210_v18 = vperm.slane %v5108_v29, 3 }
 0x160   : > { %2709 = vmatpush.msrb.mxu3 %v1866_v50  ;;  %2649 = vmatpush.msrb.mxu0 %v1674_v4  ;;  %v1266_v25 = vperm.slane %v5082_v20, 3  ;;  %v1854_v48 = vmul.f32 %v1342_v21, %v5116_v39  ;;  %v1662_v57 = vmul.f32 %v1150_v47, %v5116_v39  ;;  %v1334_v26 = vperm.slane %v5083_v33, 3 }
 0x161   : > { %2669 = vmatpush.msrb.mxu1 %v1738_v35  ;;  %2691 = vmatpush.msrb.mxu2 %v1794_v63  ;;  %v1142_v19 = vperm.slane %v4059_v62, 3  ;;  %v1726_v51 = vmul.f32 %v1214_v12, %v5116_v39  ;;  %v1782_v45 = vmul.f32 %v1270_v27, %v5116_v39  ;;  %v1206_v29 = vperm.slane %v4128_v2, 3 }
 0x162   : > { %2710 = vmatpush.msrb.mxu3 %v1862_v40  ;;  %2650 = vmatpush.msrb.mxu0 %v1670_v37  ;;  %v1262_v20 = vperm.slane %v4100_v28, 3  ;;  %v1850_v59 = vmul.f32 %v1338_v34, %v5116_v39  ;;  %v1658_v32 = vmul.f32 %v1146_v9, %v5116_v39  ;;  %v1330_v33 = vperm.slane %v4102_v55, 3  ;;  %v5135_v37 = vld [vmem:[#allocation10_spill] sm:$0xff]  ;;  %v5139_v34 = vld [vmem:[#allocation7_spill] sm:$0xff] }
 0x163   : > { %2670 = vmatpush.msrb.mxu1 %v1734_v6  ;;  %2692 = vmatpush.msrb.mxu2 %v1790_v53  ;;  %v1138_v62 = vperm.slane %v4118_v60, 3  ;;  %v1722_v8 = vmul.f32 %v1210_v18, %v5116_v39  ;;  %v1778_v56 = vmul.f32 %v1266_v25, %v5116_v39  ;;  %v1202_v2 = vperm.slane %v4134_v14, 3  ;;  %v5136_v53 = vld [vmem:[#allocation44_spill] sm:$0xff]  ;;  %v5140_v18 = vld [vmem:[#allocation47_spill] sm:$0xff] }
 0x164   : > { %2711 = vmatpush.msrb.mxu3 %v1858_v10  ;;  %2651 = vmatpush.msrb.mxu0 %v1666_v22  ;;  %v1258_v28 = vperm.slane %v4142_v31, 3  ;;  %v1846_v52 = vmul.f32 %v1334_v26, %v5116_v39  ;;  %v1654_v50 = vmul.f32 %v1142_v19, %v5116_v39  ;;  %v1326_v55 = vperm.slane %v4157_v5, 3 }
 0x165   : > { %2671 = vmatpush.msrb.mxu1 %v1730_v54  ;;  %2693 = vmatpush.msrb.mxu2 %v1786_v41  ;;  %v1718_v60 = vmul.f32 %v1206_v29, %v5116_v39  ;;  %v1774_v4 = vmul.f32 %v1262_v20, %v5116_v39  ;;  %v1134_v13 = vperm.slane %v4161_v7, 3  ;;  %v1198_v14 = vperm.slane %v4176_v11, 3  ;;  %v2933_v54 = vld.sshfl [vmem:[#allocation1 + $0x18] sm:$0xff pattern:$0x75316420]  ;;  %v5143_v29 = vld [vmem:[#allocation22_spill] sm:$0xff] }
 0x166   : > { %2712 = vmatpush.msrb.mxu3 %v1854_v48  ;;  %2652 = vmatpush.msrb.mxu0 %v1662_v57  ;;  %v1842_v31 = vmul.f32 %v1330_v33, %v5116_v39  ;;  %v1650_v30 = vmul.f32 %v1138_v62, %v5116_v39  ;;  %v1254_v44 = vperm.slane %v4192_v42, 3  ;;  %v1322_v5 = vperm.slane %v4195_v24, 3  ;;  %v5141_v48 = vld [vmem:[#allocation49_spill] sm:$0xff]  ;;  %v5145_v62 = vld [vmem:[#allocation30_spill] sm:$0xff] }
 0x167   : > { %2672 = vmatpush.msrb.mxu1 %v1726_v51  ;;  %2694 = vmatpush.msrb.mxu2 %v1782_v45  ;;  %v1714_v0 = vmul.f32 %v1202_v2, %v5116_v39  ;;  %v1770_v35 = vmul.f32 %v1258_v28, %v5116_v39  ;;  %v1130_v7 = vperm.slane %v4213_v58, 3  ;;  %v1838_v11 = vmul.f32 %v1326_v55, %v5116_v39  ;;  %v5142_v51 = vld [vmem:[#allocation50_spill] sm:$0xff] }
 0x168   : > { %2713 = vmatpush.msrb.mxu3 %v1850_v59  ;;  %2653 = vmatpush.msrb.mxu0 %v1658_v32  ;;  %v1194_v63 = vperm.slane %v4220_v36, 3  ;;  %v1250_v38 = vperm.slane %v4235_v15, 3  ;;  %v1646_v42 = vmul.f32 %v1134_v13, %v5116_v39  ;;  %v1710_v24 = vmul.f32 %v1198_v14, %v5116_v39  ;;  %v5144_v32 = vld [vmem:[#allocation51_spill] sm:$0xff] }
 0x169   : > { %2673 = vmatpush.msrb.mxu1 %v1722_v8  ;;  %2695 = vmatpush.msrb.mxu2 %v1778_v56  ;;  %v1318_v17 = vperm.slane %v4242_v3, 3  ;;  %v1766_v58 = vmul.f32 %v1254_v44, %v5116_v39  ;;  %v1834_v16 = vmul.f32 %v1322_v5, %v5116_v39  ;;  %v1126_v40 = vperm.slane %v4257_v43, 3 }
 0x16a   : > { %2714 = vmatpush.msrb.mxu3 %v1846_v52  ;;  %2654 = vmatpush.msrb.mxu0 %v1654_v50  ;;  %v1642_v36 = vmul.f32 %v1130_v7, %v5116_v39  ;;  %v1190_v15 = vperm.slane %v4271_v46, 3  ;;  %v1246_v21 = vperm.slane %v5135_v37, 3  ;;  %v1706_v3 = vmul.f32 %v1194_v63, %v5116_v39  ;;  %v5138_v46 = vld [vmem:[#allocation46_spill] sm:$0xff] }
 0x16b   : > { %2674 = vmatpush.msrb.mxu1 %v1718_v60  ;;  %2696 = vmatpush.msrb.mxu2 %v1774_v4  ;;  %v1762_v47 = vmul.f32 %v1250_v38, %v5116_v39  ;;  %v1314_v6 = vperm.slane %v4294_v23, 3  ;;  %v1122_v12 = vperm.slane %v5136_v53, 3  ;;  %v1830_v43 = vmul.f32 %v1318_v17, %v5116_v39 }
 0x16c   : > { %2715 = vmatpush.msrb.mxu3 %v1842_v31  ;;  %2655 = vmatpush.msrb.mxu0 %v1650_v30  ;;  %v1186_v27 = vperm.slane %v5137_v61, 3  ;;  %v1242_v10 = vperm.slane %v5138_v46, 3  ;;  %v1638_v22 = vmul.f32 %v1126_v40, %v5116_v39  ;;  %v1310_v9 = vperm.slane %v5139_v34, 3 }
 0x16d   : > { %2675 = vmatpush.msrb.mxu1 %v1714_v0  ;;  %2697 = vmatpush.msrb.mxu2 %v1770_v35  ;;  %v1702_v23 = vmul.f32 %v1190_v15, %v5116_v39  ;;  %v1758_v41 = vmul.f32 %v1246_v21, %v5116_v39  ;;  %v1118_v25 = vperm.slane %v5140_v18, 3  ;;  %v1182_v57 = vperm.slane %v5141_v48, 3 }
 0x16e   : > { %2716 = vmatpush.msrb.mxu3 %v1838_v11  ;;  %2622 = vmatmul.f32.vlgmr.msra.gmra.mxu2 %v2932_v1  ;;  %v1826_v26 = vmul.f32 %v1314_v6, %v5116_v39  ;;  %v1634_v19 = vmul.f32 %v1122_v12, %v5116_v39  ;;  %v1306_v45 = vperm.slane %v5142_v51, 3  ;;  %v1698_v20 = vmul.f32 %v1186_v27, %v5116_v39 }
 0x16f   : > { %2656 = vmatpush.msrb.mxu0 %v1646_v42  ;;  %2676 = vmatpush.msrb.mxu1 %v1710_v24  ;;  %v1754_v59 = vmul.f32 %v1242_v10, %v5116_v39  ;;  %v1114_v33 = vperm.slane %v5144_v32, 3  ;;  %v1822_v8 = vmul.f32 %v1310_v9, %v5116_v39  ;;  %v1178_v56 = vperm.slane %v5117_v49, 3 }
 0x170   : > { %2698 = vmatpush.msrb.mxu2 %v1766_v58  ;;  %2717 = vmatpush.msrb.mxu3 %v1834_v16  ;;  %v1630_v2 = vmul.f32 %v1118_v25, %v5116_v39  ;;  %v1694_v28 = vmul.f32 %v1182_v57, %v5116_v39  ;;  %v1818_v52 = vmul.f32 %v1306_v45, %v5116_v39  ;;  %vm2732_vm10 = vcmask 1043456  }
 0x171   : > { %2642 = vmatmul.f32.vlgmr.msra.gmra.mxu3 %v2933_v54  ;;  %2657 = vmatpush.msrb.mxu0 %v1642_v36  ;;  %v1626_v50 = vmul.f32 %v1114_v33, %v5116_v39  ;;  %v1690_v55 = vmul.f32 %v1178_v56, %v5116_v39 }
 0x172   : > { %2677 = vmatpush.msrb.mxu1 %v1706_v3  ;;  %2699 = vmatpush.msrb.mxu2 %v1762_v47 }
 0x173   : > { %2718 = vmatpush.msrb.mxu3 %v1830_v43  ;;  %2582 = vmatmul.f32.vlgmr.msra.gmra.mxu0 %v5143_v29 }
 0x174   : > { %2602 = vmatmul.f32.vlgmr.msra.gmra.mxu1 %v5145_v62  ;;  %2658 = vmatpush.msrb.mxu0 %v1638_v22 }
 0x175   : > { %2678 = vmatpush.msrb.mxu1 %v1702_v23  ;;  %2700 = vmatpush.msrb.mxu2 %v1758_v41 }
 0x176   : > { %2719 = vmatpush.msrb.mxu3 %v1826_v26  ;;  %2659 = vmatpush.msrb.mxu0 %v1634_v19 }
 0x177   : > { %2679 = vmatpush.msrb.mxu1 %v1698_v20  ;;  %2701 = vmatpush.msrb.mxu2 %v1754_v59 }
 0x178   : > { %2720 = vmatpush.msrb.mxu3 %v1822_v8  ;;  %2702 = vmatmul.f32.vlgmr.msrb.gmra.mxu2 %v2932_v1 }
 0x179   : > { %2660 = vmatpush.msrb.mxu0 %v1630_v2  ;;  %2680 = vmatpush.msrb.mxu1 %v1694_v28 }
 0x17a   : > { %2721 = vmatpush.msrb.mxu3 %v1818_v52 }
 0x17b   : > { %2722 = vmatmul.f32.vlgmr.msrb.gmra.mxu3 %v2933_v54  ;;  %2661 = vmatpush.msrb.mxu0 %v1626_v50 }
 0x17c   : > { %2681 = vmatpush.msrb.mxu1 %v1690_v55  ;;  %2662 = vmatmul.f32.vlgmr.msrb.gmra.mxu0 %v5143_v29 }
 0x17d   : > { %2682 = vmatmul.f32.vlgmr.msrb.gmra.mxu1 %v5145_v62 }
 0x190   : > { %v2463_v4 = vpop.f32.mrf.mxu2 }
 0x196   : > { %v2483_v13 = vpop.f32.mrf.mxu3 }
 0x1ac   : > { %v2423_v49 = vpop.f32.mrf.mxu0 }
 0x1ad   : > { %v2443_v60 = vpop.f32.mrf.mxu1 }
 0x1ae   : > { %v2444_v14 = vadd.f32 %v2443_v60, %v2423_v49 }
 0x1b0   : > { %v2464_v5 = vadd.f32 %v2463_v4, %v2444_v14 }
 0x1b2   : > { %v2484_v11 = vadd.f32 %v2483_v13, %v2464_v5 }
 0x1b6   : > { %v2503_v31 = vpop.f32.mrf.mxu0 }
 0x1b7   : > { %v2523_v30 = vpop.f32.mrf.mxu1  ;;  %v2543_v39 = vpop.f32.mrf.mxu2 }
 0x1b8   : > { %v2524_v44 = vadd.f32 %v2523_v30, %v2503_v31 }
 0x1ba   : > { %v2544_v0 = vadd.f32 %v2543_v39, %v2524_v44  ;;  %v2563_v35 = vpop.f32.mrf.mxu3 }
 0x1bc   : > { %v2564_v7 = vadd.f32 %v2563_v35, %v2544_v0 }
 0x1be   : > { %v2730_v63 = vrot.slane %v2564_v7, 4 }
 0x1c0   : > { %v2733_v38 = vsel %vm2732_vm10, %v2484_v11, %v2730_v63 }
 0x1c1   : > { %2737 = vst [vmem:[%s194_s5] sm:$0xff] %v2733_v38 }
 0x1f0   : > { %v2583_v42 = vpop.f32.mrf.mxu0 }
 0x1f1   : > { %v2603_v24 = vpop.f32.mrf.mxu1  ;;  %v2623_v17 = vpop.f32.mrf.mxu2 }
 0x1f2   : > { %v2604_v16 = vadd.f32 %v2603_v24, %v2583_v42 }
 0x1f4   : > { %v2643_v58 = vpop.f32.mrf.mxu3  ;;  %v2624_v21 = vadd.f32 %v2623_v17, %v2604_v16 }
 0x1f6   : > { %v2644_v6 = vadd.f32 %v2643_v58, %v2624_v21 }
 0x1f9   : > { %v2663_v40 = vpop.f32.mrf.mxu0 }
 0x1fa   : > { %v2683_v36 = vpop.f32.mrf.mxu1 }
 0x1fb   : > { %v2684_v15 = vadd.f32 %v2683_v36, %v2663_v40  ;;  %v2703_v37 = vpop.f32.mrf.mxu2 }
 0x1fd   : > { %v2704_v1 = vadd.f32 %v2703_v37, %v2684_v15 }
 0x1fe   : > { %v2723_v3 = vpop.f32.mrf.mxu3 }
 0x1ff   : > { %v2724_v47 = vadd.f32 %v2723_v3, %v2704_v1 }
 0x201   : > { %v2731_v53 = vrot.slane %v2724_v47, 4 }
 0x203   : > { %v2734_v12 = vsel %vm2732_vm10, %v2644_v6, %v2731_v53 }
 0x204   : > { %2738 = vst [vmem:[%s194_s5 + $0x8] sm:$0xff] %v2734_v12 }
 0x205   : > { %2961 = shalt.err (!%p2958_p5)
}
 0x206   : > { %2877 = dma.vmem_to_hbm [thread:$0]  (%p3069_p4), %s2756_s16, 256, %s2758_s18, %s2740_s12  }
 0x207 PF: > { %p2883_p6 = scmp.ge.s32.totalorder %s3012_s14, 2  ;;  %s2769_s29 = sand.u32 1, %s2992_s9  }
 0x208   : > { %s2770_s30 = scalar_lea.sflag [#allocation4], %s2769_s29 }
 0x209   : > { %p2880_p7 = pnand %p2883_p6, %p3076_p8 }
 0x20b   : > { %p2881_p9 = pneg %p2880_p7 }
 0x20d   : > { %2987 = dma.done.wait (%p2881_p9), %s2770_s30, 256  }
 0x20e   : > { %2989 = vsyncadd (%p2881_p9), %s2770_s30, 4294967040  ;;  %s15_s14 = sadd.s32 1, %s3012_s14   ;;  %s5146_s9 = smov %s2996_s10 }
 0x20f   : > { %p12_p10 = scmp.ge.s32.totalorder %s15_s14, 4   ;;  %s5147_s10 = smov %s3000_s11 }
 0x210   : > { %s5148_s11 = smov %s3082_s22  ;;  %s5149_s12 = smov %s3008_s13 }
 0x211   : > { %s5150_s13 = smov %s5152_s17  ;;  %14 = sbr.rel (!%p12_p10) target bundleno = 4 (0x4), region = 67 }
 0x216   :  { %2776 = vsyncpa [#allocation4], 1 }
 0x217   :  { %2778 = vsyncpa [#allocation4 + $0x1], 1 }

</bundles_post_ra>
